<compile_context>
chip_gen: v7x
topology: tpu7x:2x2x1
jax: 0.10.0
libtpu: 0.0.40
codegen_flags: <defaults>
</compile_context>

<pallas_src>
import functools

import numpy as np

import jax
import jax.numpy as jnp
from jax.experimental import pallas as pl
from jax.experimental.pallas import tpu as pltpu


MXU_DTYPE = jnp.bfloat16   # MXU / gather-matrix dtype (accumulation is f32)
LRELU_SLOPE = 0.1


def _lrelu(v):
    return jnp.where(v > 0, v, LRELU_SLOPE * v)


def _vmem_limit_bytes(frac=0.7, default=64 * 1024 * 1024):
    """Explicit scoped-VMEM budget: ~70% of physical (96 MiB on v5e/v6e,
    ~44 MiB on v7x); conservative fallback if the query is unavailable."""
    try:
        cap = int(pltpu.get_tpu_info().vmem_capacity_bytes)
        return max(int(cap * frac), 32 * 1024 * 1024)
    except Exception:
        return default


# ----------------------------------------------------------------------------
# Fused conv1 + conv2 (3x3, stride 1, pad 1, bias, LeakyReLU after each).
# The conv1 activation and its zero halo never leave VMEM.
# ----------------------------------------------------------------------------
def _fused_conv_kernel(x_ref, w1_ref, b1_ref, w2_ref, b2_ref, o_ref,
                       col_ref, fpad_ref, *, H, W, C1, C2):
    # x_ref:   (H+2, W+2, C1)  padded cat([x, y]) channels-last, f32
    # w1_ref:  (9*C1, C2)      conv1 im2col weights (MXU dtype), row = t*C1+cin
    # b1_ref:  (1, C2)         f32
    # w2_ref:  (9*C2, C2)      conv2 im2col weights, output channels permuted
    # b2_ref:  (1, C2)         f32
    # o_ref:   (H*W, C2)       lrelu(conv2) in [dy | dx] channel order
    # col_ref: (H*W, 9*C1)     shared im2col slab (MXU dtype)
    # fpad_ref:(H+2, W+2, C2)  zero-haloed conv1 activation (f32, VMEM only)
    P = H * W
    f32 = jnp.float32
    cdt = col_ref.dtype

    # ---- conv1: write the 9 shifted slices straight into the slab, then one
    #      K = 9*C1 MXU matmul. ------------------------------------------------
    xf = x_ref[...]
    for t in range(9):
        dh, dw = t // 3, t % 3
        col_ref[:, t * C1:(t + 1) * C1] = (
            xf[dh:dh + H, dw:dw + W, :].reshape(P, C1).astype(cdt))
    feat = _lrelu(jnp.dot(col_ref[...], w1_ref[...],
                          preferred_element_type=f32) + b1_ref[...])   # (P, C2)

    # ---- conv2: halo stays in VMEM (cheap re-zero of a small scratch; no HBM
    #      round-trip and no HBM masked stores). ------------------------------
    fpad_ref[...] = jnp.zeros_like(fpad_ref)
    fpad_ref[1:H + 1, 1:W + 1, :] = feat.reshape(H, W, C2)
    fp = fpad_ref[...]
    for t in range(9):
        dh, dw = t // 3, t % 3
        col_ref[:, t * C2:(t + 1) * C2] = (
            fp[dh:dh + H, dw:dw + W, :].reshape(P, C2).astype(cdt))
    out = jnp.dot(col_ref[:, :9 * C2], w2_ref[...],
                  preferred_element_type=f32) + b2_ref[...]
    o_ref[...] = _lrelu(out)


def fused_offset_convs(cat_pad, w1, b1, w2, b2, perm):
    """lrelu(conv2(lrelu(conv1(cat)))) fused into one pallas_call.
    cat_pad: (B, H+2, W+2, 2*C) channels-last, already zero-padded.
    conv2's output channels are permuted by `perm` so (dy, dx) pairs come out
    de-interleaved as [all dy | all dx] (column m = g*9 + tap).
    Returns (B, H*W, C) f32 in that permuted channel order."""
    B, Hp, Wp, C1 = cat_pad.shape
    H, W = Hp - 2, Wp - 2
    C2 = w1.shape[0]

    w1_t = jnp.transpose(w1, (2, 3, 1, 0)).reshape(9 * C1, C2).astype(MXU_DTYPE)
    b1_t = b1.reshape(1, C2).astype(jnp.float32)
    w2p = w2[perm]                      # permute OUTPUT channels (trace-time)
    b2p = b2[perm]
    w2_t = jnp.transpose(w2p, (2, 3, 1, 0)).reshape(9 * C2, C2).astype(MXU_DTYPE)
    b2_t = b2p.reshape(1, C2).astype(jnp.float32)

    kernel = functools.partial(_fused_conv_kernel, H=H, W=W, C1=C1, C2=C2)
    # TODO(synk): row-band (halo) spatial tiling for large H so the padded
    # image + im2col slab stay a few MB on v7x's 64 MiB VMEM.
    return pl.pallas_call(
        kernel,
        out_shape=jax.ShapeDtypeStruct((B, H * W, C2), jnp.float32),
        grid_spec=pltpu.PrefetchScalarGridSpec(
            num_scalar_prefetch=0,
            grid=(B,),
            in_specs=[
                pl.BlockSpec((None, Hp, Wp, C1), lambda b: (b, 0, 0, 0)),
                pl.BlockSpec((9 * C1, C2), lambda b: (0, 0)),
                pl.BlockSpec((1, C2), lambda b: (0, 0)),
                pl.BlockSpec((9 * C2, C2), lambda b: (0, 0)),
                pl.BlockSpec((1, C2), lambda b: (0, 0)),
            ],
            out_specs=pl.BlockSpec((None, H * W, C2), lambda b: (b, 0, 0)),
            scratch_shapes=[
                pltpu.VMEM((H * W, 9 * C1), MXU_DTYPE),      # shared im2col slab
                pltpu.VMEM((Hp, Wp, C2), jnp.float32),        # conv1 halo buffer
            ],
        ),
        compiler_params=pltpu.CompilerParams(
            dimension_semantics=("parallel",),
            vmem_limit_bytes=_vmem_limit_bytes(),
        ),
    )(cat_pad, w1_t, b1_t, w2_t, b2_t)


# ----------------------------------------------------------------------------
# Deformable 3x3 conv (DCNv1) + LeakyReLU, spatially tiled over P = H*W.
# ----------------------------------------------------------------------------
def _dcn_kernel(x_ref, off_ref, w_ref, b_ref, o_ref, samp_ref,
                *, H, W, OG, COG):
    # x_ref:   (P, C)        full image, channels-last, f32
    # off_ref: (PT, 2*OG*9)  [dy | dx] de-interleaved, column m = g*9 + t (f32)
    # w_ref:   (9*C, F)      block-diagonal grouped weights (MXU dtype)
    # b_ref:   (1, F)        f32
    # o_ref:   (PT, F)       output tile
    # samp_ref:(PT, 9*C)     bilinear-sample slab (MXU dtype)
    P = H * W
    C = OG * COG
    OG9 = OG * 9
    PT = o_ref.shape[0]
    f32 = jnp.float32
    cdt = samp_ref.dtype

    offy = off_ref[:, :OG9]                              # (PT, OG*9)
    offx = off_ref[:, OG9:]

    # global pixel coordinates of this spatial tile
    row = pl.program_id(1) * PT + jax.lax.broadcasted_iota(jnp.int32, (PT, 1), 0)
    h_base = (row // W).astype(f32)
    w_base = (row % W).astype(f32)

    # per-column kernel-tap displacement (column m = g*9 + t)
    col = jax.lax.broadcasted_iota(jnp.int32, (1, OG9), 1)
    tap = col % 9
    kdy = (tap // 3 - 1).astype(f32)
    kdx = (tap % 3 - 1).astype(f32)

    # vectorised bilinear bookkeeping for ALL taps/groups at once
    py = h_base + kdy + offy
    px = w_base + kdx + offx
    y0f = jnp.floor(py)
    x0f = jnp.floor(px)
    ly = py - y0f
    lx = px - x0f
    y0 = y0f.astype(jnp.int32)
    x0 = x0f.astype(jnp.int32)

    vy0 = ((y0 >= 0) & (y0 <= H - 1)).astype(f32)
    vy1 = ((y0 >= -1) & (y0 <= H - 2)).astype(f32)
    vx0 = ((x0 >= 0) & (x0 <= W - 1)).astype(f32)
    vx1 = ((x0 >= -1) & (x0 <= W - 2)).astype(f32)
    # gather-matrix dtype directly (bf16 on v6e/v7x; set MXU_DTYPE=f32 on v5e)
    w00 = ((1.0 - ly) * (1.0 - lx) * vy0 * vx0).astype(cdt)
    w01 = ((1.0 - ly) * lx * vy0 * vx1).astype(cdt)
    w10 = (ly * (1.0 - lx) * vy1 * vx0).astype(cdt)
    w11 = (ly * lx * vy1 * vx1).astype(cdt)

    s_base = y0 * W + x0                                 # flat corner-00 index
    iota_p = jax.lax.broadcasted_iota(jnp.int32, (1, P), 1)

    # Group-masked full-width copies of the source image (disjoint channel
    # supports) so each tap's gather matmul produces a full (PT, C) slab with
    # no result-column slicing.
    ch = jax.lax.broadcasted_iota(jnp.int32, (1, C), 1)
    xf = x_ref[...]
    if OG == 1:
        xg = [xf.astype(cdt)]
    else:
        xg = [jnp.where((ch >= g * COG) & (ch < (g + 1) * COG), xf, 0.0).astype(cdt)
              for g in range(OG)]

    zero = jnp.zeros((), cdt)
    # TODO(synk): band the gather source axis (P) with lax.fori_loop (or switch
    # to a true gather) for very large images so (PT, P) temporaries stay a few
    # MB on v7x.
    for t in range(9):
        acc_t = None
        for g in range(OG):
            m = g * 9 + t
            # delta of every source pixel to this tap's corner-00 index: the 4
            # bilinear corners sit at deltas {0, 1, W, W+1}.  Out-of-image
            # corners carry zero weight (validity masks above), so zero-padding
            # border semantics stay exact -- no lane shifts, no extended
            # one-hot.
            d = iota_p - s_base[:, m:m + 1]                         # (PT, P)
            gm = (jnp.where(d == 0, w00[:, m:m + 1], zero)
                  + jnp.where(d == 1, w01[:, m:m + 1], zero)
                  + jnp.where(d == W, w10[:, m:m + 1], zero)
                  + jnp.where(d == W + 1, w11[:, m:m + 1], zero))   # (PT, P)
            part = jnp.dot(gm, xg[g], preferred_element_type=f32)   # (PT, C)
            acc_t = part if acc_t is None else acc_t + part
        samp_ref[:, t * C:(t + 1) * C] = acc_t.astype(cdt)          # one store/tap

    # one merged MXU matmul against the block-diagonal grouped weight slab
    out = jnp.dot(samp_ref[...], w_ref[...], preferred_element_type=f32)
    o_ref[...] = _lrelu(out + b_ref[...])


def deform_conv3x3_lrelu(x_flat, off_flat, w, b, *, groups, H, W, p_tile=None):
    """torchvision-style deform_conv2d (3x3, stride 1, pad 1, dil 1) + LeakyReLU.
    x_flat: (B, H*W, C) channels-last.
    off_flat: (B, H*W, 2*OG*9) with channels [all dy | all dx], column m = g*9+t."""
    B, P, C = x_flat.shape
    F = w.shape[0]
    n_off = off_flat.shape[-1]
    if n_off % 18 != 0:
        raise ValueError("offset channels must be a multiple of 2*3*3=18")
    OG = n_off // 18            # offset groups (torchvision-style inference)
    COG = C // OG
    Cg, Fg = C // groups, F // groups

    if p_tile is None:
        # Smaller default tiles keep the (PT, P) gather temporaries bounded
        # (v7x has only 64 MiB VMEM).
        for cand in (128, 64, 32, 16, 8):
            if P % cand == 0:
                p_tile = cand
                break
        else:
            p_tile = P
    assert P % p_tile == 0 and (p_tile % 8 == 0 or p_tile == P)
    PT = p_tile

    # grouped conv weights as ONE block-diagonal (9*C, F) slab (row = t*C + c)
    W9 = jnp.zeros((9, C, F), jnp.float32)
    for gc in range(groups):
        blk = w[gc * Fg:(gc + 1) * Fg]                      # (Fg, Cg, 3, 3)
        blk = jnp.transpose(blk, (2, 3, 1, 0)).reshape(9, Cg, Fg)
        W9 = W9.at[:, gc * Cg:(gc + 1) * Cg, gc * Fg:(gc + 1) * Fg].set(blk)
    W2 = W9.reshape(9 * C, F).astype(MXU_DTYPE)
    b2 = b.reshape(1, F).astype(jnp.float32)

    kernel = functools.partial(_dcn_kernel, H=H, W=W, OG=OG, COG=COG)
    return pl.pallas_call(
        kernel,
        out_shape=jax.ShapeDtypeStruct((B, P, F), jnp.float32),
        grid_spec=pltpu.PrefetchScalarGridSpec(
            num_scalar_prefetch=0,
            grid=(B, P // PT),
            in_specs=[
                pl.BlockSpec((None, P, C), lambda bb, pp: (bb, 0, 0)),
                pl.BlockSpec((None, PT, 2 * OG * 9), lambda bb, pp: (bb, pp, 0)),
                pl.BlockSpec((9 * C, F), lambda bb, pp: (0, 0)),
                pl.BlockSpec((1, F), lambda bb, pp: (0, 0)),
            ],
            out_specs=pl.BlockSpec((None, PT, F), lambda bb, pp: (bb, pp, 0)),
            scratch_shapes=[pltpu.VMEM((PT, 9 * C), MXU_DTYPE)],
        ),
        compiler_params=pltpu.CompilerParams(
            dimension_semantics=("parallel", "parallel"),
            vmem_limit_bytes=_vmem_limit_bytes(),
        ),
    )(x_flat, off_flat, W2, b2)


# ----------------------------------------------------------------------------
# Module forward + params
# ----------------------------------------------------------------------------
def _offset_channel_perm(n_off_channels):
    """Permutation of conv2's output channels so interleaved (dy, dx) pairs come
    out de-interleaved as [all dy | all dx] with column m = g*9 + tap (the layout
    the DCN kernel consumes).  Returns (perm, inverse_perm)."""
    assert n_off_channels % 18 == 0
    OG = n_off_channels // 18
    dy = [g * 18 + 2 * k for g in range(OG) for k in range(9)]
    dx = [g * 18 + 2 * k + 1 for g in range(OG) for k in range(9)]
    perm = np.array(dy + dx, dtype=np.int32)
    inv = np.empty_like(perm)
    inv[perm] = np.arange(len(perm), dtype=np.int32)
    return perm, inv


def init_params(key, n_feats, groups):
    ks = jax.random.split(key, 6)
    s = 0.05
    return {
        "w1": s * jax.random.normal(ks[0], (n_feats, 2 * n_feats, 3, 3), jnp.float32),
        "b1": s * jax.random.normal(ks[1], (n_feats,), jnp.float32),
        "w2": s * jax.random.normal(ks[2], (n_feats, n_feats, 3, 3), jnp.float32),
        "b2": s * jax.random.normal(ks[3], (n_feats,), jnp.float32),
        "w_dcn": s * jax.random.normal(ks[4], (n_feats, n_feats // groups, 3, 3), jnp.float32),
        "b_dcn": s * jax.random.normal(ks[5], (n_feats,), jnp.float32),
    }


def stage3_forward(params, x, y, *, groups, p_tile=None):
    """x, y: [B, n_feats, H, W] (NCHW).  Returns (offset, output_fea), NCHW."""
    B, C, H, W = x.shape
    # NCHW -> channels-last once, at the module boundary.
    x_nhwc = jnp.transpose(x, (0, 2, 3, 1))
    y_nhwc = jnp.transpose(y, (0, 2, 3, 1))
    cat_pad = jnp.pad(jnp.concatenate([x_nhwc, y_nhwc], axis=-1),
                      ((0, 0), (1, 1), (1, 1), (0, 0)))              # (B,H+2,W+2,2C)

    perm, inv_perm = _offset_channel_perm(C)
    off_perm = fused_offset_convs(cat_pad, params["w1"], params["b1"],
                                  params["w2"], params["b2"], perm)  # (B,H*W,C)

    x_flat = x_nhwc.reshape(B, H * W, C)
    out_flat = deform_conv3x3_lrelu(x_flat, off_perm,
                                    params["w_dcn"], params["b_dcn"],
                                    groups=groups, H=H, W=W, p_tile=p_tile)

    # Un-permute offset channels back to the module's native (interleaved)
    # order; this gather fuses into the NHWC->NCHW transpose copy.
    off_flat = off_perm[:, :, inv_perm]
    offset = jnp.transpose(off_flat.reshape(B, H, W, C), (0, 3, 1, 2))
    output_fea = jnp.transpose(out_flat.reshape(B, H, W, C), (0, 3, 1, 2))
    return offset, output_fea


if __name__ == "__main__":
    # n_feats must be a multiple of 18 (offset channels = 2 * offset_groups * 9)
    # and divisible by `groups` (grouped deform conv).
    n_feats, groups = 36, 4
    B, H, W = 2, 8, 8

    key = jax.random.PRNGKey(0)
    kx, ky, kp = jax.random.split(key, 3)
    x = jax.random.normal(kx, (B, n_feats, H, W), jnp.float32)
    y = jax.random.normal(ky, (B, n_feats, H, W), jnp.float32)
    params = init_params(kp, n_feats, groups)

    # p_tile=32 exercises the DCN spatial-tile grid axis even at this toy size.
    offset, output_fea = stage3_forward(params, x, y, groups=groups, p_tile=32)
    jax.block_until_ready((offset, output_fea))

    assert offset.shape == (B, n_feats, H, W)
    assert output_fea.shape == (B, n_feats, H, W)
    assert bool(jnp.all(jnp.isfinite(offset)))
    assert bool(jnp.all(jnp.isfinite(output_fea)))
    print("KERNEL_OK")
</pallas_src>

<mosaic_0001>
module attributes {stable_mosaic.version = 11 : i64} {
  func.func @_fused_conv_kernel(%arg0: i32, %arg1: memref<1x10x10x72xf32, #tpu.memory_space<vmem>>, %arg2: memref<648x36xbf16, #tpu.memory_space<vmem>>, %arg3: memref<1x36xf32, #tpu.memory_space<vmem>>, %arg4: memref<324x36xbf16, #tpu.memory_space<vmem>>, %arg5: memref<1x36xf32, #tpu.memory_space<vmem>>, %arg6: memref<1x64x36xf32, #tpu.memory_space<vmem>>, %arg7: memref<64x648xbf16, #tpu.memory_space<vmem>>, %arg8: memref<10x10x36xf32, #tpu.memory_space<vmem>>) attributes {dimension_semantics = [#tpu.dimension_semantics<parallel>], iteration_bounds = array<i64: 2>, scalar_prefetch = 0 : i64, scratch_operands = 2 : i64, tpu.core_type = #tpu.core_type<tc>, window_params = [{transform_indices = @transform_0, window_bounds = array<i64: 1, 10, 10, 72>}, {pipeline_mode = #tpu.pipeline_mode<synchronous>, transform_indices = @transform_1, window_bounds = array<i64: 648, 36>}, {pipeline_mode = #tpu.pipeline_mode<synchronous>, transform_indices = @transform_2, window_bounds = array<i64: 1, 36>}, {pipeline_mode = #tpu.pipeline_mode<synchronous>, transform_indices = @transform_3, window_bounds = array<i64: 324, 36>}, {pipeline_mode = #tpu.pipeline_mode<synchronous>, transform_indices = @transform_4, window_bounds = array<i64: 1, 36>}, {transform_indices = @transform_5, window_bounds = array<i64: 1, 64, 36>}]} {
    %c0 = arith.constant 0 : index
    %c0_0 = arith.constant 0 : index
    %c0_1 = arith.constant 0 : index
    %c0_2 = arith.constant 0 : index
    %0 = vector.load %arg1[%c0, %c0_0, %c0_1, %c0_2] : memref<1x10x10x72xf32, #tpu.memory_space<vmem>>, vector<1x10x10x72xf32>
    %1 = vector.shape_cast %0 : vector<1x10x10x72xf32> to vector<10x10x72xf32>
    %2 = vector.extract_strided_slice %1 {offsets = [0, 0, 0], sizes = [8, 8, 72], strides = [1, 1, 1]} : vector<10x10x72xf32> to vector<8x8x72xf32>
    %3 = vector.shape_cast %2 : vector<8x8x72xf32> to vector<64x72xf32>
    %4 = arith.truncf %3 : vector<64x72xf32> to vector<64x72xbf16>
    %c0_3 = arith.constant 0 : index
    %c0_4 = arith.constant 0 : index
    %5 = vector.load %arg7[%c0_3, %c0_4] : memref<64x648xbf16, #tpu.memory_space<vmem>>, vector<64x72xbf16>
    tpu.vector_store %arg7[%c0_3, %c0_4], %4 {strides = array<i32>} : memref<64x648xbf16, #tpu.memory_space<vmem>>, vector<64x72xbf16>,
    %6 = vector.extract_strided_slice %1 {offsets = [0, 1, 0], sizes = [8, 8, 72], strides = [1, 1, 1]} : vector<10x10x72xf32> to vector<8x8x72xf32>
    %7 = vector.shape_cast %6 : vector<8x8x72xf32> to vector<64x72xf32>
    %8 = arith.truncf %7 : vector<64x72xf32> to vector<64x72xbf16>
    %c0_5 = arith.constant 0 : index
    %c72 = arith.constant 72 : index
    %9 = vector.load %arg7[%c0_5, %c72] : memref<64x648xbf16, #tpu.memory_space<vmem>>, vector<64x72xbf16>
    tpu.vector_store %arg7[%c0_5, %c72], %8 {strides = array<i32>} : memref<64x648xbf16, #tpu.memory_space<vmem>>, vector<64x72xbf16>,
    %10 = vector.extract_strided_slice %1 {offsets = [0, 2, 0], sizes = [8, 8, 72], strides = [1, 1, 1]} : vector<10x10x72xf32> to vector<8x8x72xf32>
    %11 = vector.shape_cast %10 : vector<8x8x72xf32> to vector<64x72xf32>
    %12 = arith.truncf %11 : vector<64x72xf32> to vector<64x72xbf16>
    %c0_6 = arith.constant 0 : index
    %c144 = arith.constant 144 : index
    %13 = vector.load %arg7[%c0_6, %c144] : memref<64x648xbf16, #tpu.memory_space<vmem>>, vector<64x72xbf16>
    tpu.vector_store %arg7[%c0_6, %c144], %12 {strides = array<i32>} : memref<64x648xbf16, #tpu.memory_space<vmem>>, vector<64x72xbf16>,
    %14 = vector.extract_strided_slice %1 {offsets = [1, 0, 0], sizes = [8, 8, 72], strides = [1, 1, 1]} : vector<10x10x72xf32> to vector<8x8x72xf32>
    %15 = vector.shape_cast %14 : vector<8x8x72xf32> to vector<64x72xf32>
    %16 = arith.truncf %15 : vector<64x72xf32> to vector<64x72xbf16>
    %c0_7 = arith.constant 0 : index
    %c216 = arith.constant 216 : index
    %17 = vector.load %arg7[%c0_7, %c216] : memref<64x648xbf16, #tpu.memory_space<vmem>>, vector<64x72xbf16>
    tpu.vector_store %arg7[%c0_7, %c216], %16 {strides = array<i32>} : memref<64x648xbf16, #tpu.memory_space<vmem>>, vector<64x72xbf16>,
    %18 = vector.extract_strided_slice %1 {offsets = [1, 1, 0], sizes = [8, 8, 72], strides = [1, 1, 1]} : vector<10x10x72xf32> to vector<8x8x72xf32>
    %19 = vector.shape_cast %18 : vector<8x8x72xf32> to vector<64x72xf32>
    %20 = arith.truncf %19 : vector<64x72xf32> to vector<64x72xbf16>
    %c0_8 = arith.constant 0 : index
    %c288 = arith.constant 288 : index
    %21 = vector.load %arg7[%c0_8, %c288] : memref<64x648xbf16, #tpu.memory_space<vmem>>, vector<64x72xbf16>
    tpu.vector_store %arg7[%c0_8, %c288], %20 {strides = array<i32>} : memref<64x648xbf16, #tpu.memory_space<vmem>>, vector<64x72xbf16>,
    %22 = vector.extract_strided_slice %1 {offsets = [1, 2, 0], sizes = [8, 8, 72], strides = [1, 1, 1]} : vector<10x10x72xf32> to vector<8x8x72xf32>
    %23 = vector.shape_cast %22 : vector<8x8x72xf32> to vector<64x72xf32>
    %24 = arith.truncf %23 : vector<64x72xf32> to vector<64x72xbf16>
    %c0_9 = arith.constant 0 : index
    %c360 = arith.constant 360 : index
    %25 = vector.load %arg7[%c0_9, %c360] : memref<64x648xbf16, #tpu.memory_space<vmem>>, vector<64x72xbf16>
    tpu.vector_store %arg7[%c0_9, %c360], %24 {strides = array<i32>} : memref<64x648xbf16, #tpu.memory_space<vmem>>, vector<64x72xbf16>,
    %26 = vector.extract_strided_slice %1 {offsets = [2, 0, 0], sizes = [8, 8, 72], strides = [1, 1, 1]} : vector<10x10x72xf32> to vector<8x8x72xf32>
    %27 = vector.shape_cast %26 : vector<8x8x72xf32> to vector<64x72xf32>
    %28 = arith.truncf %27 : vector<64x72xf32> to vector<64x72xbf16>
    %c0_10 = arith.constant 0 : index
    %c432 = arith.constant 432 : index
    %29 = vector.load %arg7[%c0_10, %c432] : memref<64x648xbf16, #tpu.memory_space<vmem>>, vector<64x72xbf16>
    tpu.vector_store %arg7[%c0_10, %c432], %28 {strides = array<i32>} : memref<64x648xbf16, #tpu.memory_space<vmem>>, vector<64x72xbf16>,
    %30 = vector.extract_strided_slice %1 {offsets = [2, 1, 0], sizes = [8, 8, 72], strides = [1, 1, 1]} : vector<10x10x72xf32> to vector<8x8x72xf32>
    %31 = vector.shape_cast %30 : vector<8x8x72xf32> to vector<64x72xf32>
    %32 = arith.truncf %31 : vector<64x72xf32> to vector<64x72xbf16>
    %c0_11 = arith.constant 0 : index
    %c504 = arith.constant 504 : index
    %33 = vector.load %arg7[%c0_11, %c504] : memref<64x648xbf16, #tpu.memory_space<vmem>>, vector<64x72xbf16>
    tpu.vector_store %arg7[%c0_11, %c504], %32 {strides = array<i32>} : memref<64x648xbf16, #tpu.memory_space<vmem>>, vector<64x72xbf16>,
    %34 = vector.extract_strided_slice %1 {offsets = [2, 2, 0], sizes = [8, 8, 72], strides = [1, 1, 1]} : vector<10x10x72xf32> to vector<8x8x72xf32>
    %35 = vector.shape_cast %34 : vector<8x8x72xf32> to vector<64x72xf32>
    %36 = arith.truncf %35 : vector<64x72xf32> to vector<64x72xbf16>
    %c0_12 = arith.constant 0 : index
    %c576 = arith.constant 576 : index
    %37 = vector.load %arg7[%c0_12, %c576] : memref<64x648xbf16, #tpu.memory_space<vmem>>, vector<64x72xbf16>
    tpu.vector_store %arg7[%c0_12, %c576], %36 {strides = array<i32>} : memref<64x648xbf16, #tpu.memory_space<vmem>>, vector<64x72xbf16>,
    %c0_13 = arith.constant 0 : index
    %c0_14 = arith.constant 0 : index
    %38 = vector.load %arg7[%c0_13, %c0_14] : memref<64x648xbf16, #tpu.memory_space<vmem>>, vector<64x648xbf16>
    %c0_15 = arith.constant 0 : index
    %c0_16 = arith.constant 0 : index
    %39 = vector.load %arg2[%c0_15, %c0_16] : memref<648x36xbf16, #tpu.memory_space<vmem>>, vector<648x36xbf16>
    %cst = arith.constant dense<0.000000e+00> : vector<64x36xf32>
    %40 = tpu.matmul %38, %39, %cst {dimension_numbers = #tpu.dot_dimension_numbers<[1], [0], [0], [1], [0, 0, 1, 1], [], []>} : vector<64x648xbf16>, vector<648x36xbf16>, vector<64x36xf32> -> vector<64x36xf32>
    %c0_17 = arith.constant 0 : index
    %c0_18 = arith.constant 0 : index
    %41 = vector.load %arg3[%c0_17, %c0_18] : memref<1x36xf32, #tpu.memory_space<vmem>>, vector<1x36xf32>
    %42 = vector.broadcast %41 : vector<1x36xf32> to vector<64x36xf32>
    %43 = arith.addf %40, %42 : vector<64x36xf32>
    %cst_19 = arith.constant 0.000000e+00 : f32
    %44 = vector.broadcast %cst_19 : f32 to vector<64x36xf32>
    %45 = arith.cmpf ogt, %43, %44 : vector<64x36xf32>
    %cst_20 = arith.constant 1.000000e-01 : f32
    %46 = vector.broadcast %cst_20 : f32 to vector<64x36xf32>
    %47 = arith.mulf %46, %43 : vector<64x36xf32>
    %48 = arith.select %45, %43, %47 : vector<64x36xi1>, vector<64x36xf32>
    %cst_21 = arith.constant 0.000000e+00 : f32
    %49 = vector.broadcast %cst_21 : f32 to vector<10x10x36xf32>
    %c0_22 = arith.constant 0 : index
    %c0_23 = arith.constant 0 : index
    %c0_24 = arith.constant 0 : index
    %50 = vector.load %arg8[%c0_22, %c0_23, %c0_24] : memref<10x10x36xf32, #tpu.memory_space<vmem>>, vector<10x10x36xf32>
    tpu.vector_store %arg8[%c0_22, %c0_23, %c0_24], %49 {strides = array<i32>} : memref<10x10x36xf32, #tpu.memory_space<vmem>>, vector<10x10x36xf32>,
    %51 = vector.shape_cast %48 : vector<64x36xf32> to vector<8x8x36xf32>
    %c1 = arith.constant 1 : index
    %c1_25 = arith.constant 1 : index
    %c0_26 = arith.constant 0 : index
    %52 = vector.load %arg8[%c1, %c1_25, %c0_26] : memref<10x10x36xf32, #tpu.memory_space<vmem>>, vector<8x8x36xf32>
    tpu.vector_store %arg8[%c1, %c1_25, %c0_26], %51 {strides = array<i32>} : memref<10x10x36xf32, #tpu.memory_space<vmem>>, vector<8x8x36xf32>,
    %c0_27 = arith.constant 0 : index
    %c0_28 = arith.constant 0 : index
    %c0_29 = arith.constant 0 : index
    %53 = vector.load %arg8[%c0_27, %c0_28, %c0_29] : memref<10x10x36xf32, #tpu.memory_space<vmem>>, vector<10x10x36xf32>
    %54 = vector.extract_strided_slice %53 {offsets = [0, 0, 0], sizes = [8, 8, 36], strides = [1, 1, 1]} : vector<10x10x36xf32> to vector<8x8x36xf32>
    %55 = vector.shape_cast %54 : vector<8x8x36xf32> to vector<64x36xf32>
    %56 = arith.truncf %55 : vector<64x36xf32> to vector<64x36xbf16>
    %c0_30 = arith.constant 0 : index
    %c0_31 = arith.constant 0 : index
    %57 = vector.load %arg7[%c0_30, %c0_31] : memref<64x648xbf16, #tpu.memory_space<vmem>>, vector<64x36xbf16>
    tpu.vector_store %arg7[%c0_30, %c0_31], %56 {strides = array<i32>} : memref<64x648xbf16, #tpu.memory_space<vmem>>, vector<64x36xbf16>,
    %58 = vector.extract_strided_slice %53 {offsets = [0, 1, 0], sizes = [8, 8, 36], strides = [1, 1, 1]} : vector<10x10x36xf32> to vector<8x8x36xf32>
    %59 = vector.shape_cast %58 : vector<8x8x36xf32> to vector<64x36xf32>
    %60 = arith.truncf %59 : vector<64x36xf32> to vector<64x36xbf16>
    %c0_32 = arith.constant 0 : index
    %c36 = arith.constant 36 : index
    %61 = vector.load %arg7[%c0_32, %c36] : memref<64x648xbf16, #tpu.memory_space<vmem>>, vector<64x36xbf16>
    tpu.vector_store %arg7[%c0_32, %c36], %60 {strides = array<i32>} : memref<64x648xbf16, #tpu.memory_space<vmem>>, vector<64x36xbf16>,
    %62 = vector.extract_strided_slice %53 {offsets = [0, 2, 0], sizes = [8, 8, 36], strides = [1, 1, 1]} : vector<10x10x36xf32> to vector<8x8x36xf32>
    %63 = vector.shape_cast %62 : vector<8x8x36xf32> to vector<64x36xf32>
    %64 = arith.truncf %63 : vector<64x36xf32> to vector<64x36xbf16>
    %c0_33 = arith.constant 0 : index
    %c72_34 = arith.constant 72 : index
    %65 = vector.load %arg7[%c0_33, %c72_34] : memref<64x648xbf16, #tpu.memory_space<vmem>>, vector<64x36xbf16>
    tpu.vector_store %arg7[%c0_33, %c72_34], %64 {strides = array<i32>} : memref<64x648xbf16, #tpu.memory_space<vmem>>, vector<64x36xbf16>,
    %66 = vector.extract_strided_slice %53 {offsets = [1, 0, 0], sizes = [8, 8, 36], strides = [1, 1, 1]} : vector<10x10x36xf32> to vector<8x8x36xf32>
    %67 = vector.shape_cast %66 : vector<8x8x36xf32> to vector<64x36xf32>
    %68 = arith.truncf %67 : vector<64x36xf32> to vector<64x36xbf16>
    %c0_35 = arith.constant 0 : index
    %c108 = arith.constant 108 : index
    %69 = vector.load %arg7[%c0_35, %c108] : memref<64x648xbf16, #tpu.memory_space<vmem>>, vector<64x36xbf16>
    tpu.vector_store %arg7[%c0_35, %c108], %68 {strides = array<i32>} : memref<64x648xbf16, #tpu.memory_space<vmem>>, vector<64x36xbf16>,
    %70 = vector.extract_strided_slice %53 {offsets = [1, 1, 0], sizes = [8, 8, 36], strides = [1, 1, 1]} : vector<10x10x36xf32> to vector<8x8x36xf32>
    %71 = vector.shape_cast %70 : vector<8x8x36xf32> to vector<64x36xf32>
    %72 = arith.truncf %71 : vector<64x36xf32> to vector<64x36xbf16>
    %c0_36 = arith.constant 0 : index
    %c144_37 = arith.constant 144 : index
    %73 = vector.load %arg7[%c0_36, %c144_37] : memref<64x648xbf16, #tpu.memory_space<vmem>>, vector<64x36xbf16>
    tpu.vector_store %arg7[%c0_36, %c144_37], %72 {strides = array<i32>} : memref<64x648xbf16, #tpu.memory_space<vmem>>, vector<64x36xbf16>,
    %74 = vector.extract_strided_slice %53 {offsets = [1, 2, 0], sizes = [8, 8, 36], strides = [1, 1, 1]} : vector<10x10x36xf32> to vector<8x8x36xf32>
    %75 = vector.shape_cast %74 : vector<8x8x36xf32> to vector<64x36xf32>
    %76 = arith.truncf %75 : vector<64x36xf32> to vector<64x36xbf16>
    %c0_38 = arith.constant 0 : index
    %c180 = arith.constant 180 : index
    %77 = vector.load %arg7[%c0_38, %c180] : memref<64x648xbf16, #tpu.memory_space<vmem>>, vector<64x36xbf16>
    tpu.vector_store %arg7[%c0_38, %c180], %76 {strides = array<i32>} : memref<64x648xbf16, #tpu.memory_space<vmem>>, vector<64x36xbf16>,
    %78 = vector.extract_strided_slice %53 {offsets = [2, 0, 0], sizes = [8, 8, 36], strides = [1, 1, 1]} : vector<10x10x36xf32> to vector<8x8x36xf32>
    %79 = vector.shape_cast %78 : vector<8x8x36xf32> to vector<64x36xf32>
    %80 = arith.truncf %79 : vector<64x36xf32> to vector<64x36xbf16>
    %c0_39 = arith.constant 0 : index
    %c216_40 = arith.constant 216 : index
    %81 = vector.load %arg7[%c0_39, %c216_40] : memref<64x648xbf16, #tpu.memory_space<vmem>>, vector<64x36xbf16>
    tpu.vector_store %arg7[%c0_39, %c216_40], %80 {strides = array<i32>} : memref<64x648xbf16, #tpu.memory_space<vmem>>, vector<64x36xbf16>,
    %82 = vector.extract_strided_slice %53 {offsets = [2, 1, 0], sizes = [8, 8, 36], strides = [1, 1, 1]} : vector<10x10x36xf32> to vector<8x8x36xf32>
    %83 = vector.shape_cast %82 : vector<8x8x36xf32> to vector<64x36xf32>
    %84 = arith.truncf %83 : vector<64x36xf32> to vector<64x36xbf16>
    %c0_41 = arith.constant 0 : index
    %c252 = arith.constant 252 : index
    %85 = vector.load %arg7[%c0_41, %c252] : memref<64x648xbf16, #tpu.memory_space<vmem>>, vector<64x36xbf16>
    tpu.vector_store %arg7[%c0_41, %c252], %84 {strides = array<i32>} : memref<64x648xbf16, #tpu.memory_space<vmem>>, vector<64x36xbf16>,
    %86 = vector.extract_strided_slice %53 {offsets = [2, 2, 0], sizes = [8, 8, 36], strides = [1, 1, 1]} : vector<10x10x36xf32> to vector<8x8x36xf32>
    %87 = vector.shape_cast %86 : vector<8x8x36xf32> to vector<64x36xf32>
    %88 = arith.truncf %87 : vector<64x36xf32> to vector<64x36xbf16>
    %c0_42 = arith.constant 0 : index
    %c288_43 = arith.constant 288 : index
    %89 = vector.load %arg7[%c0_42, %c288_43] : memref<64x648xbf16, #tpu.memory_space<vmem>>, vector<64x36xbf16>
    tpu.vector_store %arg7[%c0_42, %c288_43], %88 {strides = array<i32>} : memref<64x648xbf16, #tpu.memory_space<vmem>>, vector<64x36xbf16>,
    %c0_44 = arith.constant 0 : index
    %c0_45 = arith.constant 0 : index
    %90 = vector.load %arg7[%c0_44, %c0_45] : memref<64x648xbf16, #tpu.memory_space<vmem>>, vector<64x324xbf16>
    %c0_46 = arith.constant 0 : index
    %c0_47 = arith.constant 0 : index
    %91 = vector.load %arg4[%c0_46, %c0_47] : memref<324x36xbf16, #tpu.memory_space<vmem>>, vector<324x36xbf16>
    %cst_48 = arith.constant dense<0.000000e+00> : vector<64x36xf32>
    %92 = tpu.matmul %90, %91, %cst_48 {dimension_numbers = #tpu.dot_dimension_numbers<[1], [0], [0], [1], [0, 0, 1, 1], [], []>} : vector<64x324xbf16>, vector<324x36xbf16>, vector<64x36xf32> -> vector<64x36xf32>
    %c0_49 = arith.constant 0 : index
    %c0_50 = arith.constant 0 : index
    %93 = vector.load %arg5[%c0_49, %c0_50] : memref<1x36xf32, #tpu.memory_space<vmem>>, vector<1x36xf32>
    %94 = vector.broadcast %93 : vector<1x36xf32> to vector<64x36xf32>
    %95 = arith.addf %92, %94 : vector<64x36xf32>
    %cst_51 = arith.constant 0.000000e+00 : f32
    %96 = vector.broadcast %cst_51 : f32 to vector<64x36xf32>
    %97 = arith.cmpf ogt, %95, %96 : vector<64x36xf32>
    %cst_52 = arith.constant 1.000000e-01 : f32
    %98 = vector.broadcast %cst_52 : f32 to vector<64x36xf32>
    %99 = arith.mulf %98, %95 : vector<64x36xf32>
    %100 = arith.select %97, %95, %99 : vector<64x36xi1>, vector<64x36xf32>
    %c0_53 = arith.constant 0 : index
    %c0_54 = arith.constant 0 : index
    %c0_55 = arith.constant 0 : index
    %101 = vector.load %arg6[%c0_53, %c0_54, %c0_55] : memref<1x64x36xf32, #tpu.memory_space<vmem>>, vector<1x64x36xf32>
    %102 = vector.shape_cast %101 : vector<1x64x36xf32> to vector<64x36xf32>
    %103 = vector.shape_cast %100 : vector<64x36xf32> to vector<1x64x36xf32>
    tpu.vector_store %arg6[%c0_53, %c0_54, %c0_55], %103 {strides = array<i32>} : memref<1x64x36xf32, #tpu.memory_space<vmem>>, vector<1x64x36xf32>,
    return
  }
  func.func @transform_0(%arg0: i32) -> (i32, i32, i32, i32) {
    %c0_i32 = arith.constant 0 : i32
    %c0_i32_0 = arith.constant 0 : i32
    %c0_i32_1 = arith.constant 0 : i32
    %c0_i32_2 = arith.constant 0 : i32
    return %arg0, %c0_i32, %c0_i32_0, %c0_i32_1 : i32, i32, i32, i32
  }
  func.func @transform_1(%arg0: i32) -> (i32, i32) {
    %c0_i32 = arith.constant 0 : i32
    %c0_i32_0 = arith.constant 0 : i32
    %c0_i32_1 = arith.constant 0 : i32
    return %c0_i32, %c0_i32_0 : i32, i32
  }
  func.func @transform_2(%arg0: i32) -> (i32, i32) {
    %c0_i32 = arith.constant 0 : i32
    %c0_i32_0 = arith.constant 0 : i32
    %c0_i32_1 = arith.constant 0 : i32
    return %c0_i32, %c0_i32_0 : i32, i32
  }
  func.func @transform_3(%arg0: i32) -> (i32, i32) {
    %c0_i32 = arith.constant 0 : i32
    %c0_i32_0 = arith.constant 0 : i32
    %c0_i32_1 = arith.constant 0 : i32
    return %c0_i32, %c0_i32_0 : i32, i32
  }
  func.func @transform_4(%arg0: i32) -> (i32, i32) {
    %c0_i32 = arith.constant 0 : i32
    %c0_i32_0 = arith.constant 0 : i32
    %c0_i32_1 = arith.constant 0 : i32
    return %c0_i32, %c0_i32_0 : i32, i32
  }
  func.func @transform_5(%arg0: i32) -> (i32, i32, i32) {
    %c0_i32 = arith.constant 0 : i32
    %c0_i32_0 = arith.constant 0 : i32
    %c0_i32_1 = arith.constant 0 : i32
    return %arg0, %c0_i32, %c0_i32_0 : i32, i32, i32
  }
}

</mosaic_0001>

<bundles_post_ra>
// kernel: tpu_custom_call.1
= control target key start
LH: loop header
LB: loop body
LE: loop exit
PB: predicated region body
PF: predicated region fallthrough
CT: control target
= control target key end

     0   :  { %10 = vsyncpa [#allocation5], 0  ;;  %s3555_s0 = inlined_call_operand.hbm [shape: f32[2,10,10,72], index: 0, kind: input, shape index: {}]   ;;  %s3556_s1 = inlined_call_operand.hbm [shape: bf16[648,36], index: 1, kind: input, shape index: {}]   ;;  %s3557_s2 = inlined_call_operand.hbm [shape: f32[1,36], index: 2, kind: input, shape index: {}]   ;;  %s3558_s3 = inlined_call_operand.hbm [shape: bf16[324,36], index: 3, kind: input, shape index: {}]   ;;  %s3559_s4 = inlined_call_operand.hbm [shape: f32[1,36], index: 4, kind: input, shape index: {}]   ;;  %s3560_s5 = inlined_call_operand.hbm [shape: f32[2,64,36], index: 5, kind: output, shape index: {}]  }
   0x1   :  { %12 = vsyncpa [#allocation5 + $0x1], 0 }
   0x2   :  { %13 = vsyncpa [#allocation8], 0 }
   0x3   :  { %14 = vsyncpa [#allocation11], 0 }
   0x4   :  { %15 = vsyncpa [#allocation6], 0 }
   0x5   :  { %17 = vsyncpa [#allocation6 + $0x1], 0  ;;  %s2770_s18 = smov 0   ;;  %s2772_s19 = smov 0  }
   0x6   :  { %s2774_s20 = smov 0   ;;  %s2776_s21 = smov 0  }
   0x7 LB: > { %s2791_s22 = sadd.s32 4294967295, %s2712_s21   ;;  %s2068_s23 = sadd.s32 4294967294, %s2712_s21   ;;  %s2712_s21 = sphi %s2776_s21, %s3583_s21   ;;  %s2708_s20 = sphi %s2774_s20, %s3582_s20   ;;  %s2704_s19 = sphi %s2772_s19, %s3581_s19   ;;  %s2700_s18 = sphi %s2770_s18, %s3580_s18  }
   0x8   : > { %p43_p0 = scmp.ne.s32.totalorder %s2704_s19, %s2700_s18  ;;  %p3561_p1 = scmp.eq.s32.totalorder %s2791_s22, 0 }
   0x9   : > { %p157_p3 = scmp.eq.s32.totalorder %s2068_s23, 1  ;;  %p2069_p5 = scmp.ge.s32.totalorder %s2712_s21, 1 }
   0xa   : > { %p2800_p4 = por %p3561_p1, %p43_p0  ;;  %p164_p7 = scmp.lt.s32.totalorder %s2712_s21, 3 }
   0xb   : > { %p2805_p6 = por %p157_p3, %p43_p0  ;;  %s2714_s27 = smov [#allocation7]  }
   0xc   : > { %s3564_s24 = scalar_select %p2800_p4, 1, 0 }
   0xd   : > { %s3565_s25 = scalar_select %p2805_p6, 1, 0 }
   0xe   : > { %p2810_p8 = pnand %p2069_p5, %p164_p7  ;;  %s176_s28 = sshll.u32 %s2714_s27, 4  ;;  %s2814_s28 = int_to_ptr.vmem [resolvable:$true] %s176_s28 }
   0xf   : > { %s2715_s30 = smov [#allocation10]   ;;  %s2716_s7 = smov [#allocation9]  }
  0x10   : > { %s3566_s26 = scalar_select %p2810_p8, 1, 0 }
  0x11   : > { %p2347_p9 = pneg %p2810_p8  ;;  %s200_s6 = sshll.u32 %s2715_s30, 4  ;;  %s2825_s6 = int_to_ptr.vmem [resolvable:$true] %s200_s6 }
  0x12   : > { %s2827_s8 = sshll.u32 %s2716_s7, 4  ;;  %s2496_s11 = scalar_lea.hbm %s3556_s1, 5184  ;;  %s191_s8 = int_to_ptr.vmem [resolvable:$true] %s2827_s8 }
  0x13   : > { %p2821_p11 = pnand %p2347_p9, %p3561_p1  ;;  %p2497_p12 = scmp.ne.s32.totalorder %s3556_s1, %s2496_s11 }
  0x14   : > { %p2503_p5 = scmp.lt.u32.totalorder %s2496_s11, %s3556_s1 }
  0x15   : > { %p2837_p13 = pneg %p2821_p11 }
  0x17   : > { %p2499_p0 = pnand %p2837_p13, %p2497_p12 }
  0x19   : > { %p2500_p3 = pneg %p2499_p0 }
  0x1b   : > { %p2505_p7 = pnand %p2503_p5, %p2500_p3 }
  0x1d   : > { %2508 = shalt.err (!%p2505_p7)
}
  0x1e   : > { %s2509_s17 = scalar_lea.vmem %s2814_s28, 5184  ;;  %p2517_p2 = scmp.lt.s32.totalorder %s2814_s28, %s2814_s28 }
  0x1f   : > { %p2510_p9 = scmp.ne.s32.totalorder %s2814_s28, %s2509_s17  ;;  %p2518_p6 = scmp.lt.s32.totalorder %s2509_s17, %s2509_s17 }
  0x21   : > { %p2512_p10 = pnand %p2510_p9, %p2837_p13  ;;  %p2519_p12 = por %p2518_p6, %p2517_p2 }
  0x23   : > { %p2513_p1 = pneg %p2512_p10 }
  0x25   : > { %p2520_p0 = pnand %p2519_p12, %p2513_p1 }
  0x27   : > { %2523 = shalt.err (!%p2520_p0)
}
  0x28   : > { %s2717_s23 = smov 64   ;;  %s2718_s27 = smov 4  }
  0x29   : > { %2350 = dma.hbm_to_vmem [thread:$0]  (!%p2821_p11), %s3556_s1, 5184, %s2814_s28, [#allocation8], %s2717_s23, %s2717_s23, %s2718_s27  }
  0x2a   : > { %s2524_s11 = scalar_lea.hbm %s3558_s3, 2624 }
  0x2b   : > { %p2525_p2 = scmp.ne.s32.totalorder %s3558_s3, %s2524_s11  ;;  %p2531_p10 = scmp.lt.u32.totalorder %s2524_s11, %s3558_s3 }
  0x2d   : > { %p2527_p1 = pnand %p2525_p2, %p2837_p13 }
  0x2f   : > { %p2528_p6 = pneg %p2527_p1 }
  0x31   : > { %p2533_p3 = pnand %p2531_p10, %p2528_p6 }
  0x33   : > { %2536 = shalt.err (!%p2533_p3)
}
  0x34   : > { %s2537_s28 = scalar_lea.vmem %s2825_s6, 2624  ;;  %p2545_p12 = scmp.lt.s32.totalorder %s2825_s6, %s2825_s6 }
  0x35   : > { %p2538_p5 = scmp.ne.s32.totalorder %s2825_s6, %s2537_s28  ;;  %p2546_p0 = scmp.lt.s32.totalorder %s2537_s28, %s2537_s28 }
  0x37   : > { %p2540_p7 = pnand %p2538_p5, %p2837_p13  ;;  %p2547_p2 = por %p2546_p0, %p2545_p12 }
  0x39   : > { %p2541_p9 = pneg %p2540_p7 }
  0x3b   : > { %p2548_p1 = pnand %p2547_p2, %p2541_p9 }
  0x3d   : > { %2551 = shalt.err (!%p2548_p1)
}
  0x3e   : > { %2356 = dma.hbm_to_vmem [thread:$0]  (!%p2821_p11), %s3558_s3, 2624, %s2825_s6, [#allocation11], %s2717_s23, %s2717_s23, %s2718_s27  }
  0x3f   : > { %s2552_s10 = scalar_lea.hbm %s3557_s2, 16 }
  0x40   : > { %p2553_p6 = scmp.ne.s32.totalorder %s3557_s2, %s2552_s10  ;;  %p2559_p5 = scmp.lt.u32.totalorder %s2552_s10, %s3557_s2 }
  0x42   : > { %p2555_p10 = pnand %p2553_p6, %p2837_p13 }
  0x44   : > { %p2556_p3 = pneg %p2555_p10 }
  0x46   : > { %p2561_p7 = pnand %p2559_p5, %p2556_p3 }
  0x48   : > { %2564 = shalt.err (!%p2561_p7)
}
  0x49   : > { %s2565_s16 = scalar_lea.vmem %s191_s8, 16  ;;  %s2572_s6 = scalar_lea.vmem %s191_s8, 32 }
  0x4a   : > { %p2566_p9 = scmp.ne.s32.totalorder %s191_s8, %s2565_s16  ;;  %p2573_p2 = scmp.lt.s32.totalorder %s191_s8, %s191_s8 }
  0x4b   : > { %p2574_p1 = scmp.lt.s32.totalorder %s2572_s6, %s2565_s16 }
  0x4c   : > { %p2568_p12 = pnand %p2566_p9, %p2837_p13 }
  0x4d   : > { %p2575_p4 = por %p2574_p1, %p2573_p2 }
  0x4e   : > { %p2569_p0 = pneg %p2568_p12 }
  0x50   : > { %p2576_p8 = pnand %p2575_p4, %p2569_p0 }
  0x52   : > { %2579 = shalt.err (!%p2576_p8)
}
  0x53   : > { %2353 = dma.hbm_to_vmem [thread:$0]  (!%p2821_p11), %s3557_s2, 16, %s191_s8, [#allocation8]  }
  0x54   : > { %s2719_s28 = smov [#allocation12]   ;;  %s2580_s9 = scalar_lea.hbm %s3559_s4, 16 }
  0x55   : > { %s214_s17 = sshll.u32 %s2719_s28, 4  ;;  %p2581_p6 = scmp.ne.s32.totalorder %s3559_s4, %s2580_s9  ;;  %s215_s17 = int_to_ptr.vmem [resolvable:$true] %s214_s17 }
  0x56   : > { %p2587_p10 = scmp.lt.u32.totalorder %s2580_s9, %s3559_s4 }
  0x57   : > { %p2583_p4 = pnand %p2581_p6, %p2837_p13 }
  0x59   : > { %p2584_p8 = pneg %p2583_p4 }
  0x5b   : > { %p2589_p3 = pnand %p2587_p10, %p2584_p8 }
  0x5d   : > { %2592 = shalt.err (!%p2589_p3)
}
  0x5e   : > { %s2593_s8 = scalar_lea.vmem %s215_s17, 16  ;;  %s2600_s15 = scalar_lea.vmem %s215_s17, 32 }
  0x5f   : > { %p2594_p5 = scmp.ne.s32.totalorder %s215_s17, %s2593_s8  ;;  %p2601_p12 = scmp.lt.s32.totalorder %s215_s17, %s215_s17 }
  0x60   : > { %p2602_p0 = scmp.lt.s32.totalorder %s2600_s15, %s2593_s8 }
  0x61   : > { %p2596_p7 = pnand %p2594_p5, %p2837_p13 }
  0x62   : > { %p2603_p2 = por %p2602_p0, %p2601_p12 }
  0x63   : > { %p2597_p9 = pneg %p2596_p7 }
  0x65   : > { %p2604_p1 = pnand %p2603_p2, %p2597_p9 }
  0x67   : > { %2607 = shalt.err (!%p2604_p1)
}
  0x68   : > { %2359 = dma.hbm_to_vmem [thread:$0]  (!%p2821_p11), %s3559_s4, 16, %s215_s17, [#allocation11]  }
  0x69   : > { %s2919_s14 = sadd.s32 1, %s2712_s21   ;;  %s30_s23 = sadd.s32 1, %s2708_s20 }
  0x6a   : > { %s27_s29 = ssub.s32 %s2712_s21, %s2919_s14  ;;  %p37_p13 = scmp.ne.s32.totalorder %s2708_s20, %s2704_s19 }
  0x6b   : > { %p28_p6 = scmp.eq.s32.totalorder %s27_s29, 0  ;;  %p38_p4 = scmp.eq.s32.totalorder %s2712_s21, 0 }
  0x6c   : > { %p3569_p8 = scmp.eq.s32.totalorder %s2791_s22, 1  ;;  %p2372_p3 = scmp.lt.s32.totalorder %s2712_s21, 2 }
  0x6d   : > { %s2935_s28 = scalar_select %p28_p6, %s2708_s20, %s30_s23  }
  0x6e   : > { %p2929_p10 = por %p3569_p8, %p37_p13  ;;  %p39_p5 = por %p38_p4, %p37_p13 }
  0x6f   : > { %s225_s30 = sand.u32 1, %s2708_s20   ;;  %s2325_s17 = smul.u32 2560, %s2712_s21 }
  0x70   : > { %s2324_s7 = smul.u32 160, %s225_s30  ;;  %p2939_p11 = pnand %p2372_p3, %p39_p5 }
  0x71   : > { %s2946_s12 = scalar_lea.hbm %s3555_s0, %s2325_s17  ;;  %s2950_s15 = scalar_lea.sflag [#allocation5], %s225_s30 }
  0x72   : > { %s229_s13 = scalar_lea.vmem [#allocation4], %s2324_s7  ;;  %s2608_s16 = scalar_lea.hbm %s2946_s12, 2560 }
  0x73   : > { %s236_s8 = sshll.u32 %s229_s13, 4  ;;  %p2609_p7 = scmp.ne.s32.totalorder %s2946_s12, %s2608_s16  ;;  %s2948_s8 = int_to_ptr.vmem [resolvable:$true] %s236_s8 }
  0x74   : > { %p2610_p9 = pneg %p2939_p11  ;;  %s2613_s29 = scalar_lea.hbm %s3555_s0, 5120 }
  0x75   : > { %p2614_p2 = scmp.lt.u32.totalorder %s2946_s12, %s3555_s0  ;;  %p2615_p1 = scmp.lt.u32.totalorder %s2613_s29, %s2608_s16 }
  0x76   : > { %p2611_p12 = pnand %p2610_p9, %p2609_p7  ;;  %p2617_p6 = scmp.lt.u32.totalorder %s2608_s16, %s2946_s12 }
  0x77   : > { %p2616_p13 = por %p2615_p1, %p2614_p2 }
  0x78   : > { %p2612_p0 = pneg %p2611_p12 }
  0x79   : > { %p2618_p4 = por %p2617_p6, %p2616_p13 }
  0x7b   : > { %p2619_p8 = pnand %p2618_p4, %p2612_p0 }
  0x7d   : > { %2622 = shalt.err (!%p2619_p8)
}
  0x7e   : > { %s2623_s30 = scalar_lea.vmem %s2948_s8, 2560  ;;  %s2720_s7 = smov [#allocation4]  }
  0x7f   : > { %p2624_p3 = scmp.ne.s32.totalorder %s2948_s8, %s2623_s30  ;;  %s2628_s11 = sshll.u32 %s2720_s7, 4  ;;  %s2629_s11 = int_to_ptr.vmem [resolvable:$false] %s2628_s11 }
  0x80   : > { %s2630_s13 = scalar_lea.vmem %s2629_s11, 5120  ;;  %p2631_p12 = scmp.lt.s32.totalorder %s2948_s8, %s2629_s11 }
  0x81   : > { %p2626_p5 = pnand %p2624_p3, %p2610_p9  ;;  %p2632_p2 = scmp.lt.s32.totalorder %s2630_s13, %s2623_s30 }
  0x83   : > { %p2627_p7 = pneg %p2626_p5  ;;  %p2633_p1 = por %p2632_p2, %p2631_p12 }
  0x85   : > { %p2634_p13 = pnand %p2633_p1, %p2627_p7 }
  0x87   : > { %2637 = shalt.err (!%p2634_p13)
}
  0x88   : > { %s2721_s16 = smov 128   ;;  %s2722_s6 = smov 8  }
  0x89   : > { %2363 = dma.hbm_to_vmem [thread:$0]  (!%p2939_p11), %s2946_s12, 2560, %s2948_s8, %s2950_s15, %s2721_s16, %s2721_s16, %s2722_s6  }
  0x8a   : > { %p3572_p9 = scmp.ne.s32.totalorder %s3566_s26, 0 }
  0x8b   : > { %s2981_s23 = sand.u32 (!%p3572_p9), 1, %s2704_s19   ;;  %p3573_p0 = scmp.ne.s32.totalorder (!%p3572_p9), %s3564_s24, 0 }
  0x8c   : > { %248 = sbr.rel (%p3572_p9) target bundleno = 988 (0x3dc), region = 40  ;;  %s251_s17 = scalar_lea.sflag (!%p3572_p9), [#allocation5], %s2981_s23 }
  0x8d   : > { %s2326_s29 = smul.u32 (!%p3572_p9), 160, %s2981_s23 }
  0x8f   : > { %s2985_s10 = scalar_lea.vmem (!%p3572_p9), [#allocation4], %s2326_s29 }
  0x93   : > { %2683 = dma.done.wait (%p3573_p0), %s251_s17, 2560  }
  0x94   : > { %2685 = vsyncadd (%p3573_p0), %s251_s17, 4294964736  ;;  %p3574_p11 = scmp.eq.s32.totalorder %s2791_s22, 0 }
  0x96   : > { %2687 = dma.done.wait (%p3574_p11), [#allocation8], 5200   ;;  %p3575_p6 = pmov %p3574_p11 }
  0x98   : > { %2689 = vsyncadd (%p3575_p6), [#allocation8], 4294962096  ;;  %p3576_p4 = pmov %p3575_p6 }
  0x9a   : > { %2691 = dma.done.wait (%p3576_p4), [#allocation11], 2640   ;;  %p3577_p8 = pmov %p3576_p4 }
  0x9b   : > { %v300_v0 = vld [vmem:[%s2985_s10 + $0x10] sm:$0xff]  ;;  %v3001_v1 = vld [vmem:[%s2985_s10 + $0x20] sm:$0xff]  ;;  %vm343_vm0 = vcmask 1046528   ;;  %vm406_vm1 = vcmask 1045504   ;;  %vm322_vm2 = vcmask 588800   ;;  %s2723_s24 = smov 88  }
  0x9c   : > { %2693 = vsyncadd (%p3577_p8), [#allocation11], 4294964656  ;;  %v298_v2 = vld [vmem:[%s2985_s10] sm:$0xff]  ;;  %v464_v3 = vpack.c.bf16 %v3001_v1, %v300_v0  ;;  %v299_v4 = vld [vmem:[%s2985_s10 + $0x8] sm:$0x3]  ;;  %v347_v10 = vrot.slane %v300_v0, 1 }
  0x9d   : > { %v301_v5 = vld [vmem:[%s2985_s10 + $0x18] sm:$0x3]  ;;  %v303_v6 = vld [vmem:[%s2985_s10 + $0x28] sm:$0x3]  ;;  %v318_v7 = vpack.c.bf16 %v300_v0, %v298_v2  ;;  %v344_v8 = vrot.slane %v298_v2, 1  ;;  %v345_v9 = vrot.slane %v299_v4, 1 }
  0x9e   : > { %v348_v11 = vrot.slane %v301_v5, 1  ;;  %v3009_v12 = vld [vmem:[%s2985_s10 + $0x30] sm:$0xff]  ;;  %v3012_v13 = vld [vmem:[%s2985_s10 + $0x40] sm:$0xff]  ;;  %472 = vrot.lane.b32.xlu1 %v464_v3, %s2723_s24  ;;  %v350_v14 = vrot.slane %v3001_v1, 1  ;;  %v351_v15 = vrot.slane %v303_v6, 1  ;;  %v408_v16 = vrot.slane %v299_v4, 2 }
  0x9f   : > { %v411_v17 = vrot.slane %v301_v5, 2  ;;  %v305_v18 = vld [vmem:[%s2985_s10 + $0x38] sm:$0x3]  ;;  %323 = vst.msk [vmem:[#allocation2] sm:$0xff] %vm322_vm2, %v318_v7  ;;  %v346_v19 = vsel %vm343_vm0, %v344_v8, %v345_v9  ;;  %v465_v21 = vpack.c.bf16 %v3012_v13, %v3009_v12  ;;  %v407_v22 = vrot.slane %v298_v2, 2  ;;  %v3033_v31 = vld [vmem:[%s2985_s10 + $0x50] sm:$0xff] }
  0xa0   : > { %v3020_v20 = vsel %vm343_vm0, %v347_v10, %v348_v11  ;;  %v410_v24 = vrot.slane %v300_v0, 2  ;;  %v353_v25 = vrot.slane %v3009_v12, 1  ;;  %v307_v26 = vld [vmem:[%s2985_s10 + $0x48] sm:$0x3]  ;;  %v3028_v27 = vsel %vm343_vm0, %v350_v14, %v351_v15  ;;  %v309_v32 = vld [vmem:[%s2985_s10 + $0x58] sm:$0x3] }
  0xa1   : > { %v376_v23 = vpack.c.bf16 %v3020_v20, %v346_v19  ;;  %v409_v28 = vsel %vm406_vm1, %v407_v22, %v408_v16  ;;  %v354_v29 = vrot.slane %v305_v18, 1  ;;  %v413_v30 = vrot.slane %v3001_v1, 2  ;;  %s2724_s26 = smov 72   ;;  %v3043_v37 = vld [vmem:[%s2985_s10 + $0x60] sm:$0xff]  ;;  %v3046_v38 = vld [vmem:[%s2985_s10 + $0x68] sm:$0x3] }
  0xa2   : > { %474 = vrot.lane.b32.xlu1 %v465_v21, %s2723_s24  ;;  %v3039_v33 = vsel %vm406_vm1, %v410_v24, %v411_v17  ;;  %v414_v34 = vrot.slane %v303_v6, 2  ;;  %v416_v35 = vrot.slane %v3009_v12, 2  ;;  %v417_v36 = vrot.slane %v305_v18, 2  ;;  %v3049_v39 = vld [vmem:[%s2985_s10 + $0x70] sm:$0xff]  ;;  %v2434_v40 = vld [vmem:[#allocation7 + $0x40] sm:$0xff]   ;;  %s2725_s9 = smov 16  }
  0xa3   : > { %384 = vrot.lane.b32.xlu0 %v376_v23, %s2724_s26  ;;  %v439_v41 = vpack.c.bf16 %v3039_v33, %v409_v28  ;;  %v3053_v42 = vsel %vm343_vm0, %v353_v25, %v354_v29  ;;  %v419_v43 = vrot.slane %v3012_v13, 2  ;;  %v420_v44 = vrot.slane %v307_v26, 2  ;;  %v313_v45 = vld [vmem:[%s2985_s10 + $0x78] sm:$0x3]  ;;  %2160 = vmatprep.subr.bf16.mxu0 %v2434_v40  ;;  %v2435_v50 = vld [vmem:[#allocation7] sm:$0xff]   ;;  %v2436_v63 = vld [vmem:[#allocation7 + $0x48] sm:$0xff]  }
  0xa4   : > { %v3059_v46 = vpack.c.bf16 %v3053_v42, %v3028_v27  ;;  %v3062_v47 = vsel %vm406_vm1, %v413_v30, %v414_v34  ;;  %v3065_v48 = vsel %vm406_vm1, %v416_v35, %v417_v36  ;;  %v422_v49 = vrot.slane %v3033_v31, 2  ;;  %2161 = vmatpush3.bf16.msra.mxu0 %v2435_v50  ;;  %v2437_v4 = vld [vmem:[#allocation7 + $0x8] sm:$0xff]   ;;  %v2438_v8 = vld [vmem:[#allocation7 + $0x50] sm:$0xff]   ;;  %v3115_v10 = vld [vmem:[%s2985_s10 + $0x80] sm:$0xff]  ;;  %s2726_s12 = smov 48   ;;  %s2727_s8 = smov 104  }
  0xa5   : > { %v3070_v51 = vpack.c.bf16 %v3065_v48, %v3062_v47  ;;  %v3073_v52 = vsel %vm406_vm1, %v419_v43, %v420_v44  ;;  %v423_v53 = vrot.slane %v309_v32, 2  ;;  %v356_v54 = vrot.slane %v3012_v13, 1  ;;  %2162 = vmatprep.subr.bf16.mxu0 %v2436_v63  ;;  %v2439_v18 = vld [vmem:[#allocation7 + $0x10] sm:$0xff]   ;;  %v2440_v22 = vld [vmem:[#allocation7 + $0x58] sm:$0xff]   ;;  %v2442_v25 = vld [vmem:[#allocation7 + $0x60] sm:$0xff]   ;;  %s2728_s15 = smov 120  }
  0xa6   : > { %386 = vrot.lane.b32.xlu1 %v3059_v46, %s2724_s26  ;;  %v357_v55 = vrot.slane %v307_v26, 1  ;;  %v359_v56 = vrot.slane %v3033_v31, 1  ;;  %v360_v57 = vrot.slane %v309_v32, 1  ;;  %v362_v58 = vrot.slane %v3043_v37, 1  ;;  %v2441_v24 = vld [vmem:[#allocation7 + $0x18] sm:$0xff]   ;;  %v2443_v28 = vld [vmem:[#allocation7 + $0x20] sm:$0xff]  }
  0xa7   : > { %447 = vrot.lane.b32.xlu0 %v439_v41, %s2725_s9  ;;  %v3082_v59 = vsel %vm406_vm1, %v422_v49, %v423_v53  ;;  %v363_v60 = vrot.slane %v3046_v38, 1  ;;  %v365_v61 = vrot.slane %v3049_v39, 1  ;;  %v366_v62 = vrot.slane %v313_v45, 1  ;;  %v2447_v29 = vld [vmem:[#allocation7 + $0xc0] sm:$0xff]   ;;  %v2444_v30 = vld [vmem:[#allocation7 + $0x68] sm:$0xff]   ;;  %v2446_v36 = vld [vmem:[#allocation7 + $0x70] sm:$0xff]  }
  0xa8   : > { %v3088_v0 = vpack.c.bf16 %v3082_v59, %v3073_v52  ;;  %v3091_v2 = vsel %vm343_vm0, %v356_v54, %v357_v55  ;;  %v3094_v3 = vsel %vm343_vm0, %v359_v56, %v360_v57  ;;  %v425_v11 = vrot.slane %v3043_v37, 2  ;;  %2163 = vmatpush3.bf16.msra.mxu0 %v2437_v4  ;;  %2200 = vmatprep.subr.bf16.mxu1 %v2447_v29  ;;  %v2445_v34 = vld [vmem:[#allocation7 + $0x28] sm:$0xff]   ;;  %v2454_v40 = vld [vmem:[#allocation7 + $0xd0] sm:$0xff]   ;;  %v2450_v43 = vld [vmem:[#allocation7 + $0x78] sm:$0xff]   ;;  %s2729_s30 = smov 32   ;;  %s2730_s7 = smov 64  }
  0xa9   : > { %v3098_v5 = vpack.c.bf16 %v3094_v3, %v3091_v2  ;;  %v3101_v6 = vsel %vm343_vm0, %v362_v58, %v363_v60  ;;  %v3104_v7 = vsel %vm343_vm0, %v365_v61, %v366_v62  ;;  %v426_v14 = vrot.slane %v3046_v38, 2  ;;  %2164 = vmatprep.subr.bf16.mxu0 %v2438_v8  ;;  %v2451_v35 = vld [vmem:[#allocation7 + $0xc8] sm:$0xff]   ;;  %v2455_v41 = vld [vmem:[#allocation7 + $0x90] sm:$0xff]   ;;  %v2457_v44 = vld [vmem:[#allocation7 + $0xd8] sm:$0xff]   ;;  %s2733_s11 = smov 108   ;;  %s2734_s13 = smov 36  }
  0xaa   : > { %451 = vrot.lane.b32.xlu1 %v3088_v0, %s2725_s9  ;;  %v3112_v9 = vpack.c.bf16 %v3104_v7, %v3101_v6  ;;  %v428_v15 = vrot.slane %v3049_v39, 2  ;;  %v429_v16 = vrot.slane %v313_v45, 2  ;;  %v319_v17 = vpack.c.bf16 %v3009_v12, %v3001_v1  ;;  %v2453_v38 = vld [vmem:[#allocation7 + $0x88] sm:$0xff]   ;;  %v2458_v45 = vld [vmem:[#allocation7 + $0x98] sm:$0xff]   ;;  %v2466_v53 = vld [vmem:[#allocation7 + $0xf0] sm:$0xff]   ;;  %s2735_s16 = smov 52  }
  0xab   : > { %449 = vrot.lane.b32.xlu0 %v3070_v51, %s2725_s9  ;;  %v3124_v19 = vpack.c.bf16 %v3033_v31, %v3012_v13  ;;  %v3128_v21 = vpack.c.bf16 %v3049_v39, %v3043_v37  ;;  %v466_v1 = vpack.c.bf16 %v3043_v37, %v3033_v31  ;;  %v467_v12 = vpack.c.bf16 %v3115_v10, %v3049_v39  ;;  %v2449_v31 = vld [vmem:[#allocation7 + $0x80] sm:$0xff]   ;;  %v2448_v37 = vld [vmem:[#allocation7 + $0x30] sm:$0xff]   ;;  %v317_v60 = vld [vmem:[%s2985_s10 + $0x98] sm:$0x3]  ;;  %s2736_s6 = smov 124   ;;  %s2081_s29 = sshll.u32 %s2981_s23, 6 }
  0xac   : > { %324 = vst.msk [vmem:[#allocation2 + $0x30] sm:$0xff] %vm322_vm2, %v319_v17  ;;  %v3144_v13 = vsel %vm406_vm1, %v425_v11, %v426_v14  ;;  %v3147_v23 = vsel %vm406_vm1, %v428_v15, %v429_v16  ;;  %2165 = vmatpush3.bf16.msra.mxu0 %v2439_v18  ;;  %v529_v32 = vpack.c.bf16 %v3062_v47, %v3039_v33  ;;  %v315_v47 = vld [vmem:[%s2985_s10 + $0x88] sm:$0x3]  ;;  %v2731_v49 = vmov 0   ;;  %v316_v55 = vld [vmem:[%s2985_s10 + $0x90] sm:$0xff]  ;;  %v2469_v62 = vld [vmem:[#allocation7 + $0xf8] sm:$0xff]  }
  0xad   : > { %325 = vst.msk [vmem:[#allocation2 + $0x60] sm:$0xff] %vm322_vm2, %v3124_v19  ;;  %326 = vst.msk [vmem:[#allocation2 + $0x90] sm:$0xff] %vm322_vm2, %v3128_v21  ;;  %2166 = vmatprep.subr.bf16.mxu0 %v2440_v22  ;;  %v3153_v26 = vpack.c.bf16 %v3147_v23, %v3144_v13  ;;  %2201 = vmatpush3.bf16.msra.mxu1 %v2449_v31  ;;  %v500_v39 = vpack.c.bf16 %v3028_v27, %v3020_v20  ;;  %v2452_v27 = vld [vmem:[#allocation7 + $0x38] sm:$0xff]   ;;  %v525_v50 = vrot.slane %v3115_v10, 2  ;;  %v2467_v61 = vld [vmem:[#allocation7 + $0xb0] sm:$0xff]   ;;  %vm486_vm3 = vcmask 261120  }
  0xae   : > { %390 = vrot.lane.b32.xlu1 %v3112_v9, %s2724_s26  ;;  %2202 = vmatprep.subr.bf16.mxu1 %v2451_v35  ;;  %v530_v33 = vpack.c.bf16 %v3073_v52, %v3065_v48  ;;  %v501_v20 = vpack.c.bf16 %v3091_v2, %v3053_v42  ;;  %v2461_v48 = vld [vmem:[#allocation7 + $0xa0] sm:$0xff]   ;;  %v2463_v42 = vld [vmem:[#allocation7 + $0xe8] sm:$0xff]   ;;  %v531_v54 = vpack.c.bf16 %v3144_v13, %v3082_v59  ;;  %v496_v56 = vrot.slane %v3115_v10, 1  ;;  %v2470_v4 = vld [vmem:[#allocation7 + $0xb8] sm:$0xff]   ;;  %s3486_s17 = scalar_lea.vmem [#allocation13], %s2081_s29  ;;  %s2159_s10 = sshll.u32 %s2791_s22, 10 }
  0xaf   : > { %388 = vrot.lane.b32.xlu0 %v3098_v5, %s2724_s26  ;;  %v2464_v52 = vld [vmem:[#allocation7 + $0xa8] sm:$0xff]   ;;  %v497_v58 = vrot.slane %v315_v47, 1  ;;  %v611_v63 = vrot.slane %v316_v55, 2  ;;  %v502_v59 = vpack.c.bf16 %v3101_v6, %v3094_v3  ;;  %v612_v2 = vrot.slane %v317_v60, 2 }
  0xb0   : > { %2167 = vmatpush3.bf16.msra.mxu0 %v2441_v24  ;;  %v583_v8 = vrot.slane %v316_v55, 1  ;;  %v584_v11 = vrot.slane %v317_v60, 1  ;;  %v559_v3 = vpack.c.bf16 %v316_v55, %v3115_v10  ;;  %vm396_vm4 = vcmask 1048128   ;;  %v2474_v55 = vld [vmem:[#allocation7 + $0x140] ss:$0 sps:$4 sm:$0xff]  }
  0xb1   : > { %2168 = vmatprep.subr.bf16.mxu0 %v2442_v25  ;;  %2203 = vmatpush3.bf16.msra.mxu1 %v2453_v38  ;;  %vm398_vm5 = vcmask 130048   ;;  %vm459_vm6 = vcmask 720000   ;;  %vm484_vm7 = vcmask 1048256   ;;  %vm551_vm8 = vcmask 392192  }
  0xb2   : > { %478 = vrot.lane.b32.xlu1 %v467_v12, %s2723_s24  ;;  %2204 = vmatprep.subr.bf16.mxu1 %v2454_v40  ;;  %v585_v15 = vsel %vm343_vm0, %v583_v8, %v584_v11  ;;  %v2456_v12 = vld [vmem:[#allocation7 + $0x100] sm:$0xff]   ;;  %vm603_vm9 = vcmask 523264   ;;  %vm576_vm10 = vcmask 982400   ;;  %vm601_vm11 = vcmask 1048512  }
  0xb3   : > { %476 = vrot.lane.b32.xlu0 %v466_v1, %s2723_s24  ;;  %vm520_vm12 = vcmask 851200   ;;  %vm549_vm13 = vcmask 1048384   ;;  %vm629_vm14 = vcmask 1048064   ;;  %vm631_vm15 = vcmask 64512  }
  0xb4   : > { %2169 = vmatpush3.bf16.msra.mxu0 %v2443_v28  ;;  %vm1006_vm2 = vcmask 1043456  }
  0xb5   : > { %2170 = vmatprep.subr.bf16.mxu0 %v2444_v30  ;;  %2205 = vmatpush3.bf16.msra.mxu1 %v2455_v41 }
  0xb6   : > { %564 = vrot.lane.b32.xlu1 %v319_v17, %s2726_s12  ;;  %2206 = vmatprep.subr.bf16.mxu1 %v2457_v44 }
  0xb7   : > { %453 = vrot.lane.b32.xlu0 %v3153_v26, %s2725_s9 }
  0xb8   : > { %2171 = vmatpush3.bf16.msra.mxu0 %v2445_v34 }
  0xb9   : > { %2172 = vmatprep.subr.bf16.mxu0 %v2446_v36  ;;  %2207 = vmatpush3.bf16.msra.mxu1 %v2458_v45  ;;  %v2465_v36 = vld [vmem:[#allocation7 + $0x118] sm:$0xff]  }
  0xba   : > { %589 = vrot.lane.b32.xlu1 %v3059_v46, %s2728_s15  ;;  %v2460_v46 = vld [vmem:[#allocation7 + $0xe0] sm:$0xff]  }
  0xbb   : > { %537 = vrot.lane.b32.xlu0 %v529_v32, %s2727_s8  ;;  %2208 = vmatprep.subr.bf16.mxu1 %v2460_v46  ;;  %v2462_v32 = vld [vmem:[#allocation7 + $0x110] sm:$0xff]  }
  0xbc   : > { %2173 = vmatpush3.bf16.msra.mxu0 %v2448_v37 }
  0xbd   : > { %2174 = vmatprep.subr.bf16.mxu0 %v2450_v43  ;;  %2209 = vmatpush3.bf16.msra.mxu1 %v2461_v48 }
  0xbe   : > { %539 = vrot.lane.b32.xlu1 %v530_v33, %s2727_s8  ;;  %2210 = vmatprep.subr.bf16.mxu1 %v2463_v42  ;;  %v2468_v33 = vld [vmem:[#allocation7 + $0x120] sm:$0xff]  }
  0xbf   : > { %508 = vrot.lane.b32.xlu0 %v500_v39, %s2729_s30 }
  0xc0   : > { %2175 = vmatpush3.bf16.msra.mxu0 %v2452_v27 }
  0xc1   : > { %1140 = vmatprep.subr.bf16.mxu0 %v2731_v49  ;;  %2211 = vmatpush3.bf16.msra.mxu1 %v2464_v52  ;;  %v2473_v52 = vld [vmem:[#allocation7 + $0x138] sm:$0xff]  }
  0xc2   : > { %510 = vrot.lane.b32.xlu1 %v501_v20, %s2729_s30  ;;  %2212 = vmatprep.subr.bf16.mxu1 %v2466_v53  ;;  %v2471_v20 = vld [vmem:[#allocation7 + $0x128] sm:$0xff]  }
  0xc3   : > { %617 = vrot.lane.b32.xlu0 %v3070_v51, %s2730_s7  ;;  %v526_v51 = vrot.slane %v315_v47, 2  ;;  %v2472_v47 = vld [vmem:[#allocation7 + $0x130] sm:$0xff]  }
  0xc5   : > { %v527_v57 = vsel %vm406_vm1, %v525_v50, %v526_v51  ;;  %2213 = vmatpush3.bf16.msra.mxu1 %v2467_v61 }
  0xc6   : > { %619 = vrot.lane.b32.xlu1 %v3088_v0, %s2730_s7  ;;  %v532_v0 = vpack.c.bf16 %v527_v57, %v3147_v23  ;;  %2214 = vmatprep.subr.bf16.mxu1 %v2469_v62 }
  0xc7   : > { %566 = vrot.lane.b32.xlu0 %v3124_v19, %s2726_s12 }
  0xc9   : > { %2215 = vmatpush3.bf16.msra.mxu1 %v2470_v4 }
  0xca   : > { %568 = vrot.lane.b32.xlu1 %v3128_v21, %s2726_s12 }
  0xcb   : > { %591 = vrot.lane.b32.xlu0 %v3098_v5, %s2728_s15  ;;  %v498_v5 = vsel %vm343_vm0, %v496_v56, %v497_v58  ;;  %v1008_v58 = vsel %vm1006_vm2, %v2474_v55, 0  ;;  %vm1473_vm2 = vcmask 425088  }
  0xcc   : > { %v503_v14 = vpack.c.bf16 %v498_v5, %v3104_v7  ;;  %v587_v16 = vpack.c.bf16 %v585_v15, %v498_v5 }
  0xce   : > { %593 = vrot.lane.b32.xlu1 %v3112_v9, %s2728_s15  ;;  %v613_v9 = vsel %vm406_vm1, %v611_v63, %v612_v2 }
  0xcf   : > { %541 = vrot.lane.b32.xlu0 %v531_v54, %s2727_s8  ;;  %v615_v6 = vpack.c.bf16 %v613_v9, %v527_v57 }
  0xd2   : > { %543 = vrot.lane.b32.xlu1 %v532_v0, %s2727_s8 }
  0xd3   : > { %512 = vrot.lane.b32.xlu0 %v502_v59, %s2729_s30 }
  0xd6   : > { %514 = vrot.lane.b32.xlu1 %v503_v14, %s2729_s30 }
  0xd7   : > { %621 = vrot.lane.b32.xlu0 %v3153_v26, %s2730_s7  ;;  %v2459_v26 = vld [vmem:[#allocation7 + $0x108] sm:$0xff]  }
  0xda   : > { %623 = vrot.lane.b32.xlu1 %v615_v6, %s2730_s7 }
  0xdb   : > { %570 = vrot.lane.b32.xlu0 %v559_v3, %s2726_s12  ;;  %s1944_s12 = scalar_lea.sflag [#allocation6], %s2981_s23 }
  0xdf   : > { %595 = vrot.lane.b32.xlu0 %v587_v16, %s2728_s15  ;;  %s2737_s15 = smov [#allocation13]  }
 0x110   : > { %v473_v7 = vpop.permute.xlu1 %472 }
 0x111   : > { %487 = vst.msk [vmem:[#allocation2 + $0x10] sm:$0xff] %vm486_vm3, %v473_v7 }
 0x114   : > { %v475_v10 = vpop.permute.xlu1 %474 }
 0x115   : > { %v385_v17 = vpop.permute.xlu0 %384  ;;  %489 = vst.msk [vmem:[#allocation2 + $0x40] sm:$0xff] %vm486_vm3, %v475_v10 }
 0x116   : > { %397 = vst.msk [vmem:[#allocation2] sm:$0xff] %vm396_vm4, %v385_v17 }
 0x117   : > { %399 = vst.msk [vmem:[#allocation2 + $0x8] sm:$0xff] %vm398_vm5, %v385_v17 }
 0x118   : > { %v387_v19 = vpop.permute.xlu1 %386 }
 0x119   : > { %v448_v18 = vpop.permute.xlu0 %447  ;;  %400 = vst.msk [vmem:[#allocation2 + $0x30] sm:$0xff] %vm396_vm4, %v387_v19 }
 0x11a   : > { %460 = vst.msk [vmem:[#allocation2 + $0x8] sm:$0xff] %vm459_vm6, %v448_v18 }
 0x11b   : > { %401 = vst.msk [vmem:[#allocation2 + $0x38] sm:$0xff] %vm398_vm5, %v387_v19 }
 0x11c   : > { %485 = vst.msk [vmem:[#allocation2 + $0x8] sm:$0xff] %vm484_vm7, %v473_v7  ;;  %v452_v22 = vpop.permute.xlu1 %451 }
 0x11d   : > { %v450_v21 = vpop.permute.xlu0 %449  ;;  %v639_v24 = vld [vmem:[#allocation2] sm:$0xff] }
 0x11e   : > { %461 = vst.msk [vmem:[#allocation2 + $0x38] sm:$0xff] %vm459_vm6, %v450_v21 }
 0x11f   : > { %488 = vst.msk [vmem:[#allocation2 + $0x38] sm:$0xff] %vm484_vm7, %v475_v10  ;;  %v2732_v10 = vmov 0.0  }
 0x120   : > { %v391_v13 = vpop.permute.xlu1 %390  ;;  %v645_v31 = vld [vmem:[#allocation2 + $0x30] sm:$0xff] }
 0x121   : > { %v389_v1 = vpop.permute.xlu0 %388  ;;  %404 = vst.msk [vmem:[#allocation2 + $0x90] sm:$0xff] %vm396_vm4, %v391_v13 }
 0x122   : > { %402 = vst.msk [vmem:[#allocation2 + $0x60] sm:$0xff] %vm396_vm4, %v389_v1  ;;  %vm1229_vm4 = vcmask 293888  }
 0x123   : > { %403 = vst.msk [vmem:[#allocation2 + $0x68] sm:$0xff] %vm398_vm5, %v389_v1  ;;  %v640_v23 = vld [vmem:[#allocation2 + $0x8] sm:$0xff]  ;;  %405 = vst.msk [vmem:[#allocation2 + $0x98] sm:$0xff] %vm398_vm5, %v391_v13 }
 0x124   : > { %462 = vst.msk [vmem:[#allocation2 + $0x68] sm:$0xff] %vm459_vm6, %v452_v22  ;;  %1042 = vmatprep.mubr.bf16.mxu0 %v640_v23  ;;  %v479_v28 = vpop.permute.xlu1 %478 }
 0x125   : > { %1043 = vmatmul.mubr.bf16.vlgmr.msra.gmra.mrb[0].mxu0 %v639_v24  ;;  %v477_v25 = vpop.permute.xlu0 %476  ;;  %493 = vst.msk [vmem:[#allocation2 + $0xa0] sm:$0xff] %vm486_vm3, %v479_v28 }
 0x126   : > { %1141 = vmatpush1.bf16.msra.mxu0 %v2456_v12  ;;  %490 = vst.msk [vmem:[#allocation2 + $0x68] sm:$0xff] %vm484_vm7, %v477_v25  ;;  %v646_v29 = vld [vmem:[#allocation2 + $0x38] sm:$0xff] }
 0x127   : > { %491 = vst.msk [vmem:[#allocation2 + $0x70] sm:$0xff] %vm486_vm3, %v477_v25  ;;  %1142 = vmatprep.subr.bf16.mxu0 %v2731_v49  ;;  %1050 = vmatprep.mubr.bf16.mxu0 %v646_v29 }
 0x128   : > { %v565_v34 = vpop.permute.xlu1 %564  ;;  %v657_v50 = vld [vmem:[#allocation2 + $0x90] sm:$0xff]  ;;  %1233 = vst.msk [vmem:[#allocation3 + $0x10] sm:$0xff] %vm1229_vm4, %v2732_v10  ;;  %1230 = vst.msk [vmem:[#allocation3] sm:$0xff] %vm1229_vm4, %v2732_v10 }
 0x129   : > { %v454_v30 = vpop.permute.xlu0 %453  ;;  %v651_v43 = vld [vmem:[#allocation2 + $0x60] sm:$0xff]  ;;  %1235 = vst.msk [vmem:[#allocation3 + $0x20] sm:$0xff] %vm1229_vm4, %v2732_v10  ;;  %1237 = vst.msk [vmem:[#allocation3 + $0x30] sm:$0xff] %vm1229_vm4, %v2732_v10 }
 0x12a   : > { %1143 = vmatpush1.bf16.msra.mxu0 %v2459_v26  ;;  %463 = vst.msk [vmem:[#allocation2 + $0x98] sm:$0xff] %vm459_vm6, %v454_v30  ;;  %vm1231_vm6 = vcmask 287744  }
 0x12b   : > { %1144 = vmatprep.subr.bf16.mxu0 %v2731_v49  ;;  %492 = vst.msk [vmem:[#allocation2 + $0x98] sm:$0xff] %vm484_vm7, %v479_v28 }
 0x12c   : > { %v590_v37 = vpop.permute.xlu1 %589  ;;  %1234 = vst.msk [vmem:[#allocation3 + $0x18] sm:$0x3] %vm1231_vm6, %v2732_v10  ;;  %1232 = vst.msk [vmem:[#allocation3 + $0x8] sm:$0x3] %vm1231_vm6, %v2732_v10 }
 0x12d   : > { %1051 = vmatmul.mubr.bf16.gmra.mrb[4].mxu0 %v645_v31  ;;  %v538_v35 = vpop.permute.xlu0 %537  ;;  %v652_v38 = vld [vmem:[#allocation2 + $0x68] sm:$0xff]  ;;  %604 = vst.msk [vmem:[#allocation2 + $0x20] sm:$0xff] %vm603_vm9, %v590_v37 }
 0x12e   : > { %1145 = vmatpush1.bf16.msra.mxu0 %v2462_v32  ;;  %552 = vst.msk [vmem:[#allocation2 + $0x18] sm:$0xff] %vm551_vm8, %v538_v35  ;;  %1058 = vmatprep.mubr.bf16.mxu0 %v652_v38 }
 0x12f   : > { %1146 = vmatprep.subr.bf16.mxu0 %v2731_v49  ;;  %577 = vst.msk [vmem:[#allocation2 + $0x18] sm:$0xff] %vm576_vm10, %v565_v34 }
 0x130   : > { %602 = vst.msk [vmem:[#allocation2 + $0x18] sm:$0xff] %vm601_vm11, %v590_v37  ;;  %v540_v40 = vpop.permute.xlu1 %539 }
 0x131   : > { %v509_v39 = vpop.permute.xlu0 %508  ;;  %554 = vst.msk [vmem:[#allocation2 + $0x48] sm:$0xff] %vm551_vm8, %v540_v40 }
 0x132   : > { %1147 = vmatpush1.bf16.msra.mxu0 %v2465_v36  ;;  %521 = vst.msk [vmem:[#allocation2 + $0x10] sm:$0xff] %vm520_vm12, %v509_v39  ;;  %v658_v41 = vld [vmem:[#allocation2 + $0x98] sm:$0xff]  ;;  %v3294_v36 = vld [vmem:[#allocation9] ss:$0 sm:$0xff] }
 0x133   : > { %1148 = vmatprep.subr.bf16.mxu0 %v2731_v49  ;;  %550 = vst.msk [vmem:[#allocation2 + $0x10] sm:$0xff] %vm549_vm13, %v538_v35 }
 0x134   : > { %v511_v27 = vpop.permute.xlu1 %510  ;;  %1236 = vst.msk [vmem:[#allocation3 + $0x28] sm:$0x3] %vm1231_vm6, %v2732_v10  ;;  %1238 = vst.msk [vmem:[#allocation3 + $0x38] sm:$0x3] %vm1231_vm6, %v2732_v10 }
 0x135   : > { %1059 = vmatmul.mubr.bf16.gmra.mrb[8].mxu0 %v651_v43  ;;  %v618_v44 = vpop.permute.xlu0 %617  ;;  %522 = vst.msk [vmem:[#allocation2 + $0x40] sm:$0xff] %vm520_vm12, %v511_v27 }
 0x136   : > { %1149 = vmatpush1.bf16.msra.mxu0 %v2468_v33  ;;  %1066 = vmatprep.mubr.bf16.mxu0 %v658_v41  ;;  %630 = vst.msk [vmem:[#allocation2 + $0x20] sm:$0xff] %vm629_vm14, %v618_v44 }
 0x137   : > { %632 = vst.msk [vmem:[#allocation2 + $0x28] sm:$0xff] %vm631_vm15, %v618_v44  ;;  %1150 = vmatprep.subr.bf16.mxu0 %v2731_v49  ;;  %v642_v45 = vld [vmem:[#allocation2 + $0x18] sm:$0xff] }
 0x138   : > { %553 = vst.msk [vmem:[#allocation2 + $0x40] sm:$0xff] %vm549_vm13, %v540_v40  ;;  %1107 = vmatprep.mubr.bf16.mxu1 %v642_v45  ;;  %v620_v48 = vpop.permute.xlu1 %619 }
 0x139   : > { %v567_v46 = vpop.permute.xlu0 %566  ;;  %634 = vst.msk [vmem:[#allocation2 + $0x58] sm:$0xff] %vm631_vm15, %v620_v48 }
 0x13a   : > { %1151 = vmatpush1.bf16.msra.mxu0 %v2471_v20  ;;  %578 = vst.msk [vmem:[#allocation2 + $0x48] sm:$0xff] %vm576_vm10, %v567_v46  ;;  %v641_v42 = vld [vmem:[#allocation2 + $0x10] sm:$0xff] }
 0x13b   : > { %1152 = vmatprep.subr.bf16.mxu0 %v2731_v49  ;;  %1108 = vmatmul.mubr.bf16.vlgmr.msra.gmra.mrb[0].mxu1 %v641_v42  ;;  %1239 = vst.msk [vmem:[#allocation3 + $0x40] sm:$0xff] %vm1229_vm4, %v2732_v10  ;;  %1241 = vst.msk [vmem:[#allocation3 + $0x50] sm:$0xff] %vm1229_vm4, %v2732_v10 }
 0x13c   : > { %v569_v53 = vpop.permute.xlu1 %568  ;;  %1240 = vst.msk [vmem:[#allocation3 + $0x48] sm:$0x3] %vm1231_vm6, %v2732_v10  ;;  %1242 = vst.msk [vmem:[#allocation3 + $0x58] sm:$0x3] %vm1231_vm6, %v2732_v10 }
 0x13d   : > { %1067 = vmatmul.mubr.bf16.gmra.mrb[12].mxu0 %v657_v50  ;;  %v592_v51 = vpop.permute.xlu0 %591  ;;  %1243 = vst.msk [vmem:[#allocation3 + $0x60] sm:$0xff] %vm1229_vm4, %v2732_v10  ;;  %1245 = vst.msk [vmem:[#allocation3 + $0x70] sm:$0xff] %vm1229_vm4, %v2732_v10 }
 0x13e   : > { %1153 = vmatpush1.bf16.msra.mxu0 %v2472_v47  ;;  %v644_v54 = vld [vmem:[#allocation2 + $0x28] sm:$0xff]  ;;  %605 = vst.msk [vmem:[#allocation2 + $0x48] sm:$0xff] %vm601_vm11, %v592_v51 }
 0x13f   : > { %606 = vst.msk [vmem:[#allocation2 + $0x50] sm:$0xff] %vm603_vm9, %v592_v51  ;;  %1154 = vmatprep.subr.bf16.mxu0 %v2731_v49  ;;  %2124 = vmatprep.mubr.msk.bf16.mxu0 %vm631_vm15, %v644_v54  ;;  %v647_v63 = vld [vmem:[#allocation2 + $0x40] sm:$0xff] }
 0x140   : > { %633 = vst.msk [vmem:[#allocation2 + $0x50] sm:$0xff] %vm629_vm14, %v620_v48  ;;  %v594_v57 = vpop.permute.xlu1 %593  ;;  %v650_v59 = vld [vmem:[#allocation2 + $0x58] sm:$0xff] }
 0x141   : > { %v542_v56 = vpop.permute.xlu0 %541  ;;  %608 = vst.msk [vmem:[#allocation2 + $0x80] sm:$0xff] %vm603_vm9, %v594_v57 }
 0x142   : > { %1155 = vmatpush1.bf16.msra.mxu0 %v2473_v52  ;;  %556 = vst.msk [vmem:[#allocation2 + $0x78] sm:$0xff] %vm551_vm8, %v542_v56 }
 0x143   : > { %1156 = vmatprep.subr.bf16.mxu0 %v2731_v49  ;;  %579 = vst.msk [vmem:[#allocation2 + $0x78] sm:$0xff] %vm576_vm10, %v569_v53  ;;  %v643_v49 = vld [vmem:[#allocation2 + $0x20] sm:$0xff] }
 0x144   : > { %607 = vst.msk [vmem:[#allocation2 + $0x78] sm:$0xff] %vm601_vm11, %v594_v57  ;;  %v544_v62 = vpop.permute.xlu1 %543 }
 0x145   : > { %v513_v60 = vpop.permute.xlu0 %512  ;;  %v648_v61 = vld [vmem:[#allocation2 + $0x48] sm:$0xff]  ;;  %558 = vst.msk [vmem:[#allocation2 + $0xa8] sm:$0xff] %vm551_vm8, %v544_v62 }
 0x146   : > { %1157 = vmatpush1.bf16.msra.mxu0 %v1008_v58  ;;  %523 = vst.msk [vmem:[#allocation2 + $0x70] sm:$0xff] %vm520_vm12, %v513_v60  ;;  %1115 = vmatprep.mubr.bf16.mxu1 %v648_v61 }
 0x147   : > { %555 = vst.msk [vmem:[#allocation2 + $0x70] sm:$0xff] %vm549_vm13, %v542_v56  ;;  %1116 = vmatmul.mubr.bf16.gmra.mrb[4].mxu1 %v647_v63  ;;  %v649_v8 = vld [vmem:[#allocation2 + $0x50] sm:$0xff] }
 0x148   : > { %v515_v2 = vpop.permute.xlu1 %514  ;;  %1244 = vst.msk [vmem:[#allocation3 + $0x68] sm:$0x3] %vm1231_vm6, %v2732_v10  ;;  %1246 = vst.msk [vmem:[#allocation3 + $0x78] sm:$0x3] %vm1231_vm6, %v2732_v10 }
 0x149   : > { %1173 = vmatmul.mubr.bf16.vlgmr.msra.gmra.mrb[16].mxu0 %v643_v49  ;;  %v622_v0 = vpop.permute.xlu0 %621  ;;  %524 = vst.msk [vmem:[#allocation2 + $0xa0] sm:$0xff] %vm520_vm12, %v515_v2 }
 0x14a   : > { %2125 = vmatprep.mubr.msk.bf16.mxu0 %vm631_vm15, %v650_v59  ;;  %635 = vst.msk [vmem:[#allocation2 + $0x80] sm:$0xff] %vm629_vm14, %v622_v0 }
 0x14b   : > { %636 = vst.msk [vmem:[#allocation2 + $0x88] sm:$0xff] %vm631_vm15, %v622_v0  ;;  %v654_v4 = vld [vmem:[#allocation2 + $0x78] sm:$0xff] }
 0x14c   : > { %557 = vst.msk [vmem:[#allocation2 + $0xa0] sm:$0xff] %vm549_vm13, %v544_v62  ;;  %1123 = vmatprep.mubr.bf16.mxu1 %v654_v4  ;;  %v624_v11 = vpop.permute.xlu1 %623 }
 0x14d   : > { %v571_v5 = vpop.permute.xlu0 %570  ;;  %638 = vst.msk [vmem:[#allocation2 + $0xb8] sm:$0xff] %vm631_vm15, %v624_v11 }
 0x14e   : > { %580 = vst.msk [vmem:[#allocation2 + $0xa8] sm:$0xff] %vm576_vm10, %v571_v5  ;;  %v653_v14 = vld [vmem:[#allocation2 + $0x70] sm:$0xff] }
 0x14f   : > { %1124 = vmatmul.mubr.bf16.gmra.mrb[8].mxu1 %v653_v14  ;;  %1247 = vst.msk [vmem:[#allocation3 + $0x80] sm:$0xff] %vm1229_vm4, %v2732_v10  ;;  %1249 = vst.msk [vmem:[#allocation3 + $0x90] sm:$0xff] %vm1229_vm4, %v2732_v10  ;;  %v2476_v14 = vld [vmem:[#allocation10] sm:$0xff]  }
 0x150   : > { %1248 = vst.msk [vmem:[#allocation3 + $0x88] sm:$0x3] %vm1231_vm6, %v2732_v10  ;;  %1250 = vst.msk [vmem:[#allocation3 + $0x98] sm:$0x3] %vm1231_vm6, %v2732_v10  ;;  %vm1502_vm6 = vcmask 720288  }
 0x151   : > { %1181 = vmatmul.mubr.bf16.gmra.mrb[20].mxu0 %v649_v8  ;;  %v596_v9 = vpop.permute.xlu0 %595  ;;  %v655_v6 = vld [vmem:[#allocation2 + $0x80] sm:$0xff] }
 0x152   : > { %v656_v3 = vld [vmem:[#allocation2 + $0x88] sm:$0xff]  ;;  %609 = vst.msk [vmem:[#allocation2 + $0xa8] sm:$0xff] %vm601_vm11, %v596_v9 }
 0x153   : > { %610 = vst.msk [vmem:[#allocation2 + $0xb0] sm:$0xff] %vm603_vm9, %v596_v9  ;;  %2126 = vmatprep.mubr.msk.bf16.mxu0 %vm631_vm15, %v656_v3  ;;  %v659_v16 = vld [vmem:[#allocation2 + $0xa0] sm:$0xff]  ;;  %v2477_v9 = vld [vmem:[#allocation10 + $0x48] sm:$0xff]  }
 0x154   : > { %637 = vst.msk [vmem:[#allocation2 + $0xb0] sm:$0xff] %vm629_vm14, %v624_v11  ;;  %v662_v15 = vld [vmem:[#allocation2 + $0xb8] sm:$0xff]  ;;  %v2475_v11 = vld [vmem:[#allocation10 + $0x40] sm:$0xff]  }
 0x155   : > { %2307 = vmatprep.subr.bf16.mxu1 %v2475_v11  ;;  %2240 = vmatprep.subr.bf16.mxu0 %v2475_v11 }
 0x156   : > { %2315 = vmatpush3.bf16.msra.mxu1 %v2476_v14  ;;  %2241 = vmatpush3.bf16.msra.mxu0 %v2476_v14 }
 0x157   : > { %2308 = vmatprep.subr.bf16.mxu1 %v2477_v9  ;;  %2242 = vmatprep.subr.bf16.mxu0 %v2477_v9  ;;  %v2483_v9 = vld [vmem:[#allocation10 + $0x60] sm:$0xff]  }
 0x159   : > { %1189 = vmatmul.mubr.bf16.gmra.mrb[24].mxu0 %v655_v6  ;;  %v660_v7 = vld [vmem:[#allocation2 + $0xa8] sm:$0xff] }
 0x15a   : > { %2127 = vmatprep.mubr.msk.bf16.mxu0 %vm631_vm15, %v662_v15  ;;  %1131 = vmatprep.mubr.bf16.mxu1 %v660_v7  ;;  %v2478_v7 = vld [vmem:[#allocation10 + $0x8] sm:$0xff]   ;;  %vm1413_vm15 = vcmask 884288  }
 0x15b   : > { %1132 = vmatmul.mubr.bf16.gmra.mrb[12].mxu1 %v659_v16  ;;  %v661_v17 = vld [vmem:[#allocation2 + $0xb0] sm:$0xff]  ;;  %2243 = vmatpush3.bf16.msra.mxu0 %v2478_v7 }
 0x15c   : > { %2316 = vmatpush3.bf16.msra.mxu1 %v2478_v7 }
 0x161   : > { %1197 = vmatmul.mubr.bf16.gmra.mrb[28].mxu0 %v661_v17 }
 0x1f8   : > { %v2176_v18 = vpop.f32.mrb[0].mxu0 }
 0x1f9   : > { %v2177_v19 = vpop.f32.mrb[1].mxu0 }
 0x1fa   : > { %v2178_v21 = vadd.f32 %v2177_v19, %v2176_v18  ;;  %v2179_v22 = vpop.f32.mrb[2].mxu0 }
 0x1fb   : > { %v2180_v1 = vpop.f32.mrb[3].mxu0 }
 0x1fc   : > { %v2181_v12 = vadd.f32 %v2180_v1, %v2179_v22  ;;  %v1045_v33 = vadd.f32 %v2178_v21, %v3294_v36 }
 0x1fe   : > { %v1048_v45 = vadd.f32 %v2181_v12, %v3294_v36 }
 0x200   : > { %v2182_v13 = vpop.f32.mrb[4].mxu0 }
 0x201   : > { %v2183_v23 = vpop.f32.mrb[5].mxu0 }
 0x202   : > { %v2184_v24 = vadd.f32 %v2183_v23, %v2182_v13  ;;  %v2185_v25 = vpop.f32.mrb[6].mxu0 }
 0x203   : > { %v2186_v26 = vpop.f32.mrb[7].mxu0 }
 0x204   : > { %v2187_v28 = vadd.f32 %v2186_v26, %v2185_v25  ;;  %v1053_v58 = vadd.f32 %v2184_v24, %v3294_v36 }
 0x206   : > { %v1056_v60 = vadd.f32 %v2187_v28, %v3294_v36  ;;  %v3308_v28 = vld [vmem:[#allocation3] sm:$0xff] }
 0x208   : > { %v2188_v29 = vpop.f32.mrb[8].mxu0 }
 0x209   : > { %v2189_v30 = vpop.f32.mrb[9].mxu0 }
 0x20a   : > { %v2190_v31 = vadd.f32 %v2189_v30, %v2188_v29  ;;  %v2191_v32 = vpop.f32.mrb[10].mxu0 }
 0x20b   : > { %v2192_v34 = vpop.f32.mrb[11].mxu0 }
 0x20c   : > { %v2193_v35 = vadd.f32 %v2192_v34, %v2191_v32  ;;  %v1061_v21 = vadd.f32 %v2190_v31, %v3294_v36 }
 0x20e   : > { %v2216_v37 = vpop.f32.mrb[0].mxu1  ;;  %v1064_v22 = vadd.f32 %v2193_v35, %v3294_v36 }
 0x20f   : > { %v2217_v39 = vpop.f32.mrb[1].mxu1 }
 0x210   : > { %v2194_v38 = vpop.f32.mrb[12].mxu0  ;;  %v2218_v40 = vadd.f32 %v2217_v39, %v2216_v37  ;;  %v2219_v43 = vpop.f32.mrb[2].mxu1  ;;  %v2479_v39 = vld [vmem:[#allocation10 + $0x50] sm:$0xff]  }
 0x211   : > { %v2195_v41 = vpop.f32.mrb[13].mxu0  ;;  %v2220_v27 = vpop.f32.mrb[3].mxu1  ;;  %2309 = vmatprep.subr.bf16.mxu1 %v2479_v39  ;;  %2244 = vmatprep.subr.bf16.mxu0 %v2479_v39 }
 0x212   : > { %v3297_v44 = vadd.f32 %v2195_v41, %v2194_v38  ;;  %v2197_v20 = vpop.f32.mrb[14].mxu0  ;;  %v2221_v46 = vadd.f32 %v2220_v27, %v2219_v43  ;;  %v1110_v48 = vadd.f32 %v2218_v40, %v1045_v33  ;;  %v2480_v41 = vld [vmem:[#allocation10 + $0x10] sm:$0xff]  }
 0x213   : > { %v2198_v47 = vpop.f32.mrb[15].mxu0  ;;  %2317 = vmatpush3.bf16.msra.mxu1 %v2480_v41  ;;  %2245 = vmatpush3.bf16.msra.mxu0 %v2480_v41 }
 0x214   : > { %v3300_v42 = vadd.f32 %v2198_v47, %v2197_v20  ;;  %v1113_v50 = vadd.f32 %v2221_v46, %v1048_v45 }
 0x21a   : > { %v2222_v51 = vpop.f32.mrb[4].mxu1 }
 0x21b   : > { %v2223_v53 = vpop.f32.mrb[5].mxu1 }
 0x21c   : > { %v1174_v52 = vpop.f32.mrb[16].mxu0  ;;  %v2224_v55 = vadd.f32 %v2223_v53, %v2222_v51  ;;  %v2225_v57 = vpop.f32.mrb[6].mxu1  ;;  %v1069_v53 = vadd.f32 %v3297_v44, %v3294_v36 }
 0x21d   : > { %v1175_v54 = vadd.f32 %v1174_v52, %v1110_v48  ;;  %v1176_v56 = vpop.f32.mrb[17].mxu0  ;;  %v2226_v62 = vpop.f32.mrb[7].mxu1  ;;  %v2481_v52 = vld [vmem:[#allocation10 + $0x58] sm:$0xff]  }
 0x21e   : > { %v1177_v61 = vpop.f32.mrb[18].mxu0  ;;  %v2227_v49 = vadd.f32 %v2226_v62, %v2225_v57  ;;  %v1118_v2 = vadd.f32 %v2224_v55, %v1053_v58  ;;  %v2482_v57 = vld [vmem:[#allocation10 + $0x18] sm:$0xff]   ;;  %2310 = vmatprep.subr.bf16.mxu1 %v2481_v52  ;;  %2246 = vmatprep.subr.bf16.mxu0 %v2481_v52 }
 0x21f   : > { %vm1205_vm7 = vcmp.gt.f32.partialorder %v1175_v54, 0.0  ;;  %v1213_v63 = vmul.f32 0.1, %v1175_v54  ;;  %v1178_v59 = vadd.f32 %v1177_v61, %v1113_v50  ;;  %v1179_v0 = vpop.f32.mrb[19].mxu0  ;;  %2318 = vmatpush3.bf16.msra.mxu1 %v2482_v57  ;;  %2247 = vmatpush3.bf16.msra.mxu0 %v2482_v57 }
 0x220   : > { %v1121_v8 = vadd.f32 %v2227_v49, %v1056_v60  ;;  %2311 = vmatprep.subr.bf16.mxu1 %v2483_v9  ;;  %2248 = vmatprep.subr.bf16.mxu0 %v2483_v9 }
 0x221   : > { %v1221_v4 = vsel %vm1205_vm7, %v1175_v54, %v1213_v63  ;;  %vm1206_vm8 = vcmp.gt.f32.partialorder %v1178_v59, 0.0  ;;  %v1214_v5 = vmul.f32 0.1, %v1178_v59  ;;  %v1072_v54 = vadd.f32 %v3300_v42, %v3294_v36 }
 0x222   : > { %1252 = vst.msk [vmem:[#allocation3 + $0x11] sm:$0xff] %vm1229_vm4, %v1221_v4  ;;  %v2228_v6 = vpop.f32.mrb[8].mxu1  ;;  %vm1524_vm7 = vcmask 1015488  }
 0x223   : > { %v1222_v3 = vsel %vm1206_vm8, %v1178_v59, %v1214_v5  ;;  %v2229_v16 = vpop.f32.mrb[9].mxu1  ;;  %vm1549_vm8 = vcmask 1048544  }
 0x224   : > { %1253 = vst.msk [vmem:[#allocation3 + $0x21] sm:$0xff] %vm1229_vm4, %v1222_v3  ;;  %v1182_v15 = vpop.f32.mrb[20].mxu0  ;;  %v2230_v10 = vadd.f32 %v2229_v16, %v2228_v6  ;;  %v2231_v19 = vpop.f32.mrb[10].mxu1 }
 0x225   : > { %v1183_v17 = vadd.f32 %v1182_v15, %v1118_v2  ;;  %v1184_v18 = vpop.f32.mrb[21].mxu0  ;;  %v2232_v12 = vpop.f32.mrb[11].mxu1 }
 0x226   : > { %v1185_v1 = vpop.f32.mrb[22].mxu0  ;;  %v2233_v24 = vadd.f32 %v2232_v12, %v2231_v19  ;;  %v1126_v26 = vadd.f32 %v2230_v10, %v1061_v21 }
 0x227   : > { %vm1207_vm9 = vcmp.gt.f32.partialorder %v1183_v17, 0.0  ;;  %v1215_v13 = vmul.f32 0.1, %v1183_v17  ;;  %v1186_v23 = vadd.f32 %v1185_v1, %v1121_v8  ;;  %v1187_v25 = vpop.f32.mrb[23].mxu0 }
 0x228   : > { %v1129_v32 = vadd.f32 %v2233_v24, %v1064_v22 }
 0x229   : > { %v1223_v29 = vsel %vm1207_vm9, %v1183_v17, %v1215_v13  ;;  %vm1208_vm10 = vcmp.gt.f32.partialorder %v1186_v23, 0.0  ;;  %v1216_v30 = vmul.f32 0.1, %v1186_v23  ;;  %v3310_v34 = vld [vmem:[#allocation3 + $0x10] sm:$0xff]  ;;  %v2484_v17 = vld [vmem:[#allocation10 + $0x20] sm:$0xff]   ;;  %vm1576_vm9 = vcmask 556288  }
 0x22a   : > { %1254 = vst.msk [vmem:[#allocation3 + $0x31] sm:$0xff] %vm1229_vm4, %v1223_v29  ;;  %v1280_v38 = vpack.c.bf16 %v3310_v34, %v3308_v28  ;;  %2319 = vmatpush3.bf16.msra.mxu1 %v2484_v17  ;;  %2249 = vmatpush3.bf16.msra.mxu0 %v2484_v17  ;;  %v3395_v17 = vld [vmem:[#allocation10 + $0x80] sm:$0xff]  }
 0x22b   : > { %v1224_v31 = vsel %vm1208_vm10, %v1186_v23, %v1216_v30  ;;  %v3313_v35 = vld [vmem:[#allocation3 + $0x20] sm:$0xff]  ;;  %v3315_v37 = vld [vmem:[#allocation3 + $0x28] sm:$0x3]  ;;  %v2485_v30 = vld [vmem:[#allocation10 + $0x68] sm:$0xff]  }
 0x22c   : > { %1255 = vst.msk [vmem:[#allocation3 + $0x41] sm:$0xff] %vm1229_vm4, %v1224_v31  ;;  %v1190_v33 = vpop.f32.mrb[24].mxu0  ;;  %v1418_v40 = vpack.c.bf16 %v3313_v35, %v3310_v34  ;;  %1284 = vst.msk [vmem:[#allocation2] sm:$0xff] %vm1229_vm4, %v1280_v38  ;;  %v1310_v45 = vrot.slane %v3313_v35, 1  ;;  %v1311_v46 = vrot.slane %v3315_v37, 1  ;;  %v1367_v56 = vrot.slane %v3313_v35, 2  ;;  %2312 = vmatprep.subr.bf16.mxu1 %v2485_v30  ;;  %2250 = vmatprep.subr.bf16.mxu0 %v2485_v30 }
 0x22d   : > { %v1191_v43 = vadd.f32 %v1190_v33, %v1126_v26  ;;  %v1192_v20 = vpop.f32.mrb[25].mxu0  ;;  %v1368_v22 = vrot.slane %v3315_v37, 2 }
 0x22e   : > { %v1193_v27 = vpop.f32.mrb[26].mxu0  ;;  %1426 = vrot.lane.b32.xlu0 %v1418_v40, %s2733_s11  ;;  %v2234_v50 = vpop.f32.mrb[12].mxu1  ;;  %v3333_v44 = vsel %vm343_vm0, %v1310_v45, %v1311_v46  ;;  %v2487_v46 = vld [vmem:[#allocation10 + $0x70] sm:$0xff]  }
 0x22f   : > { %vm1209_vm11 = vcmp.gt.f32.partialorder %v1191_v43, 0.0  ;;  %v1217_v47 = vmul.f32 0.1, %v1191_v43  ;;  %v1194_v48 = vadd.f32 %v1193_v27, %v1129_v32  ;;  %v1195_v51 = vpop.f32.mrb[27].mxu0  ;;  %v2235_v55 = vpop.f32.mrb[13].mxu1  ;;  %v2486_v32 = vld [vmem:[#allocation10 + $0x28] sm:$0xff]   ;;  %v3362_v37 = vsel %vm406_vm1, %v1367_v56, %v1368_v22 }
 0x230   : > { %v2236_v61 = vadd.f32 %v2235_v55, %v2234_v50  ;;  %v2237_v62 = vpop.f32.mrb[14].mxu1  ;;  %2320 = vmatpush3.bf16.msra.mxu1 %v2486_v32  ;;  %2251 = vmatpush3.bf16.msra.mxu0 %v2486_v32  ;;  %v2489_v50 = vld [vmem:[#allocation10 + $0x78] sm:$0xff]   ;;  %v1279_v22 = vld [vmem:[#allocation3 + $0x98] sm:$0x3] }
 0x231   : > { %v1225_v58 = vsel %vm1209_vm11, %v1191_v43, %v1217_v47  ;;  %vm1210_vm12 = vcmp.gt.f32.partialorder %v1194_v48, 0.0  ;;  %v1218_v60 = vmul.f32 0.1, %v1194_v48  ;;  %v1266_v63 = vld [vmem:[#allocation3 + $0x30] sm:$0xff]  ;;  %v2238_v59 = vpop.f32.mrb[15].mxu1  ;;  %2313 = vmatprep.subr.bf16.mxu1 %v2487_v46  ;;  %2252 = vmatprep.subr.bf16.mxu0 %v2487_v46  ;;  %v2490_v51 = vld [vmem:[#allocation10 + $0x38] sm:$0xff]  }
 0x232   : > { %1256 = vst.msk [vmem:[#allocation3 + $0x51] sm:$0xff] %vm1229_vm4, %v1225_v58  ;;  %v1267_v49 = vld [vmem:[#allocation3 + $0x38] sm:$0x3]  ;;  %v1313_v36 = vrot.slane %v1266_v63, 1  ;;  %v1370_v42 = vrot.slane %v1266_v63, 2  ;;  %v3336_v0 = vpack.c.bf16 %v1266_v63, %v3313_v35  ;;  %v2239_v4 = vadd.f32 %v2238_v59, %v2237_v62 }
 0x233   : > { %v1226_v2 = vsel %vm1210_vm12, %v1194_v48, %v1218_v60  ;;  %v1134_v5 = vadd.f32 %v2236_v61, %v1069_v53  ;;  %v3338_v8 = vld [vmem:[#allocation3 + $0x40] sm:$0xff]  ;;  %v1314_v11 = vrot.slane %v1267_v49, 1  ;;  %v3340_v14 = vld [vmem:[#allocation3 + $0x48] sm:$0x3]  ;;  %v1371_v15 = vrot.slane %v1267_v49, 2  ;;  %v2488_v47 = vld [vmem:[#allocation10 + $0x30] sm:$0xff]  }
 0x234   : > { %1257 = vst.msk [vmem:[#allocation3 + $0x61] sm:$0xff] %vm1229_vm4, %v1226_v2  ;;  %v1198_v3 = vpop.f32.mrb[28].mxu0  ;;  %v1419_v6 = vpack.c.bf16 %v3338_v8, %v1266_v63  ;;  %v1373_v16 = vrot.slane %v3338_v8, 2  ;;  %v1374_v7 = vrot.slane %v3340_v14, 2  ;;  %1285 = vst.msk [vmem:[#allocation2 + $0x30] sm:$0xff] %vm1229_vm4, %v3336_v0  ;;  %v1137_v19 = vadd.f32 %v2239_v4, %v1072_v54  ;;  %2321 = vmatpush3.bf16.msra.mxu1 %v2488_v47 }
 0x235   : > { %v1199_v10 = vadd.f32 %v1198_v3, %v1134_v5  ;;  %v1200_v18 = vpop.f32.mrb[29].mxu0  ;;  %v3349_v21 = vsel %vm343_vm0, %v1313_v36, %v1314_v11  ;;  %v1372_v13 = vsel %vm406_vm1, %v1370_v42, %v1371_v15  ;;  %v1316_v27 = vrot.slane %v3338_v8, 1  ;;  %2253 = vmatpush3.bf16.msra.mxu0 %v2488_v47  ;;  %2314 = vmatprep.subr.bf16.mxu1 %v2489_v50 }
 0x236   : > { %1428 = vrot.lane.b32.xlu0 %v1419_v6, %s2733_s11  ;;  %v1201_v1 = vpop.f32.mrb[30].mxu0  ;;  %v1337_v12 = vpack.c.bf16 %v3349_v21, %v3333_v44  ;;  %v3357_v23 = vsel %vm406_vm1, %v1373_v16, %v1374_v7  ;;  %v3367_v33 = vpack.c.bf16 %v1372_v13, %v3362_v37  ;;  %v1317_v45 = vrot.slane %v3340_v14, 1  ;;  %2254 = vmatprep.subr.bf16.mxu0 %v2489_v50 }
 0x237   : > { %vm1211_vm13 = vcmp.gt.f32.partialorder %v1199_v10, 0.0  ;;  %v1219_v24 = vmul.f32 0.1, %v1199_v10  ;;  %v1202_v25 = vadd.f32 %v1201_v1, %v1137_v19  ;;  %v1483_v26 = vpack.c.bf16 %v3357_v23, %v1372_v13  ;;  %v1203_v29 = vpop.f32.mrb[31].mxu0 }
 0x238   : > { %1346 = vrot.lane.b32.xlu1 %v1337_v12, %s2734_s13  ;;  %v1318_v52 = vsel %vm343_vm0, %v1316_v27, %v1317_v45  ;;  %2322 = vmatpush3.bf16.msra.mxu1 %v2490_v51  ;;  %v1532_v29 = vrot.slane %v1279_v22, 1  ;;  %v1364_v45 = vrot.slane %v3310_v34, 2 }
 0x239   : > { %v1227_v31 = vsel %vm1211_vm13, %v1199_v10, %v1219_v24  ;;  %vm1212_vm14 = vcmp.gt.f32.partialorder %v1202_v25, 0.0  ;;  %v1220_v35 = vmul.f32 0.1, %v1202_v25  ;;  %v1270_v38 = vld [vmem:[#allocation3 + $0x50] sm:$0xff]  ;;  %v1271_v39 = vld [vmem:[#allocation3 + $0x58] sm:$0x3]  ;;  %v1454_v60 = vpack.c.bf16 %v1318_v52, %v3349_v21  ;;  %2255 = vmatpush3.bf16.msra.mxu0 %v2490_v51  ;;  %2289 = vmatprep.subr.bf16.mxu1 %v3395_v17 }
 0x23a   : > { %1258 = vst.msk [vmem:[#allocation3 + $0x71] sm:$0xff] %vm1229_vm4, %v1227_v31  ;;  %1492 = vrot.lane.b32.xlu0 %v1483_v26, %s2735_s16  ;;  %v1282_v40 = vpack.c.bf16 %v1270_v38, %v3338_v8  ;;  %v1319_v41 = vrot.slane %v1270_v38, 1  ;;  %v1320_v43 = vrot.slane %v1271_v39, 1  ;;  %v1376_v56 = vrot.slane %v1270_v38, 2  ;;  %v1278_v10 = vld [vmem:[#allocation3 + $0x90] sm:$0xff] }
 0x23b   : > { %v1228_v20 = vsel %vm1212_vm14, %v1202_v25, %v1220_v35  ;;  %v1272_v54 = vld [vmem:[#allocation3 + $0x60] sm:$0xff]  ;;  %v1273_v55 = vld [vmem:[#allocation3 + $0x68] sm:$0x3]  ;;  %v1377_v57 = vrot.slane %v1271_v39, 2  ;;  %v1263_v31 = vld [vmem:[#allocation3 + $0x18] sm:$0x3] }
 0x23c   : > { %1259 = vst.msk [vmem:[#allocation3 + $0x81] sm:$0xff] %vm1229_vm4, %v1228_v20  ;;  %1403 = vrot.lane.b32.xlu1 %v3367_v33, %s2724_s26  ;;  %1286 = vst.msk [vmem:[#allocation2 + $0x60] sm:$0xff] %vm1229_vm4, %v1282_v40  ;;  %v1321_v48 = vsel %vm343_vm0, %v1319_v41, %v1320_v43  ;;  %v1379_v62 = vrot.slane %v1272_v54, 2  ;;  %v1380_v63 = vrot.slane %v1273_v55, 2  ;;  %v1322_v49 = vrot.slane %v1272_v54, 1 }
 0x23d   : > { %v1338_v53 = vpack.c.bf16 %v1321_v48, %v1318_v52  ;;  %v1378_v59 = vsel %vm406_vm1, %v1376_v56, %v1377_v57  ;;  %v1323_v36 = vrot.slane %v1273_v55, 1  ;;  %v1420_v42 = vpack.c.bf16 %v1272_v54, %v1270_v38 }
 0x23e   : > { %1514 = vrot.lane.b32.xlu0 %v1282_v40, %s2723_s24  ;;  %v1381_v2 = vsel %vm406_vm1, %v1379_v62, %v1380_v63  ;;  %v1395_v4 = vpack.c.bf16 %v1378_v59, %v3357_v23  ;;  %v1531_v23 = vrot.slane %v1278_v10, 1  ;;  %v1307_v40 = vrot.slane %v3310_v34, 1 }
 0x23f   : > { %v1324_v8 = vsel %vm343_vm0, %v1322_v49, %v1323_v36  ;;  %v1484_v11 = vpack.c.bf16 %v1381_v2, %v1378_v59  ;;  %v1308_v41 = vrot.slane %v1263_v31, 1  ;;  %v1365_v46 = vrot.slane %v1263_v31, 2 }
 0x240   : > { %1537 = vrot.lane.b32.xlu1 %v1337_v12, %s2736_s6  ;;  %v1455_v3 = vpack.c.bf16 %v1324_v8, %v1321_v48  ;;  %v1533_v38 = vsel %vm343_vm0, %v1531_v23, %v1532_v29  ;;  %v1261_v48 = vld [vmem:[#allocation3 + $0x8] sm:$0x3]  ;;  %v1304_v51 = vrot.slane %v3308_v28, 1  ;;  %v1558_v56 = vrot.slane %v1278_v10, 2 }
 0x241   : > { %v1274_v58 = vld [vmem:[#allocation3 + $0x70] sm:$0xff]  ;;  %v1275_v5 = vld [vmem:[#allocation3 + $0x78] sm:$0x3]  ;;  %v1309_v27 = vsel %vm343_vm0, %v1307_v40, %v1308_v41  ;;  %v1366_v50 = vsel %vm406_vm1, %v1364_v45, %v1365_v46  ;;  %v1305_v52 = vrot.slane %v1261_v48, 1 }
 0x242   : > { %1539 = vrot.lane.b32.xlu0 %v1338_v53, %s2736_s6  ;;  %v1283_v61 = vpack.c.bf16 %v1274_v58, %v1272_v54  ;;  %v1325_v14 = vrot.slane %v1274_v58, 1  ;;  %v1326_v9 = vrot.slane %v1275_v5, 1  ;;  %v1382_v1 = vrot.slane %v1274_v58, 2 }
 0x243   : > { %v1276_v6 = vld [vmem:[#allocation3 + $0x80] sm:$0xff]  ;;  %v1277_v15 = vld [vmem:[#allocation3 + $0x88] sm:$0x3]  ;;  %v1383_v12 = vrot.slane %v1275_v5, 2  ;;  %v1453_v47 = vpack.c.bf16 %v3333_v44, %v1309_v27  ;;  %v1306_v34 = vsel %vm343_vm0, %v1304_v51, %v1305_v52  ;;  %v1361_v54 = vrot.slane %v3308_v28, 2 }
 0x244   : > { %1463 = vrot.lane.b32.xlu1 %v1454_v60, %s2725_s9  ;;  %1287 = vst.msk [vmem:[#allocation2 + $0x90] sm:$0xff] %vm1229_vm4, %v1283_v61  ;;  %v1327_v16 = vsel %vm343_vm0, %v1325_v14, %v1326_v9  ;;  %v1421_v7 = vpack.c.bf16 %v1276_v6, %v1274_v58  ;;  %v1478_v18 = vrot.slane %v1276_v6, 2  ;;  %v1479_v19 = vrot.slane %v1277_v15, 2  ;;  %v2492_v9 = vld [vmem:[#allocation10 + $0x88] sm:$0xff]  }
 0x245   : > { %v1339_v21 = vpack.c.bf16 %v1327_v16, %v1324_v8  ;;  %v1507_v13 = vpack.c.bf16 %v1278_v10, %v1276_v6  ;;  %v1449_v25 = vrot.slane %v1276_v6, 1  ;;  %v1450_v26 = vrot.slane %v1277_v15, 1 }
 0x246   : > { %1348 = vrot.lane.b32.xlu0 %v1338_v53, %s2734_s13  ;;  %v1480_v24 = vsel %vm406_vm1, %v1478_v18, %v1479_v19  ;;  %v1384_v30 = vsel %vm406_vm1, %v1382_v1, %v1383_v12  ;;  %v1482_v53 = vpack.c.bf16 %v3362_v37, %v1366_v50  ;;  %v1362_v44 = vrot.slane %v1261_v48, 2  ;;  %v2494_v18 = vld [vmem:[#allocation10 + $0x98] sm:$0xff]   ;;  %v2495_v1 = vld [vmem:[#allocation10 + $0xa0] ss:$0 sps:$4 sm:$0x33]  }
 0x247   : > { %v1485_v32 = vpack.c.bf16 %v1480_v24, %v1384_v30  ;;  %v1451_v35 = vsel %vm343_vm0, %v1449_v25, %v1450_v26  ;;  %v1396_v39 = vpack.c.bf16 %v1384_v30, %v1381_v2  ;;  %v1336_v55 = vpack.c.bf16 %v1309_v27, %v1306_v34 }
 0x248   : > { %1430 = vrot.lane.b32.xlu1 %v1420_v42, %s2733_s11  ;;  %v1535_v43 = vpack.c.bf16 %v1533_v38, %v1451_v35  ;;  %v1456_v20 = vpack.c.bf16 %v1451_v35, %v1327_v16  ;;  %v1363_v57 = vsel %vm406_vm1, %v1361_v54, %v1362_v44  ;;  %v1559_v58 = vrot.slane %v1279_v22, 2  ;;  %v2493_v16 = vld [vmem:[#allocation10 + $0x90] sm:$0xff]  }
 0x249   : > { %v1393_v37 = vpack.c.bf16 %v1366_v50, %v1363_v57  ;;  %vm1356_vm0 = vcmask 589088  }
 0x24a   : > { %1405 = vrot.lane.b32.xlu0 %v1395_v4, %s2724_s26 }
 0x24c   : > { %1494 = vrot.lane.b32.xlu1 %v1484_v11, %s2735_s16 }
 0x24e   : > { %1465 = vrot.lane.b32.xlu0 %v1455_v3, %s2725_s9 }
 0x250   : > { %1516 = vrot.lane.b32.xlu1 %v1283_v61, %s2723_s24 }
 0x252   : > { %1432 = vrot.lane.b32.xlu0 %v1421_v7, %s2733_s11 }
 0x254   : > { %1541 = vrot.lane.b32.xlu1 %v1339_v21, %s2736_s6 }
 0x256   : > { %1518 = vrot.lane.b32.xlu0 %v1507_v13, %s2723_s24 }
 0x258   : > { %1350 = vrot.lane.b32.xlu1 %v1339_v21, %s2734_s13 }
 0x25a   : > { %1496 = vrot.lane.b32.xlu0 %v1485_v32, %s2735_s16 }
 0x25c   : > { %1407 = vrot.lane.b32.xlu1 %v1396_v39, %s2724_s26 }
 0x25e   : > { %1543 = vrot.lane.b32.xlu0 %v1535_v43, %s2736_s6 }
 0x260   : > { %1467 = vrot.lane.b32.xlu1 %v1456_v20, %s2725_s9 }
 0x262   : > { %1461 = vrot.lane.b32.xlu0 %v1453_v47, %s2725_s9  ;;  %s3501_s9 = scalar_lea.hbm %s3560_s5, %s2159_s10 }
 0x264   : > { %1564 = vrot.lane.b32.xlu1 %v3367_v33, %s2729_s30  ;;  %v1560_v33 = vsel %vm406_vm1, %v1558_v56, %v1559_v58  ;;  %vm1438_vm1 = vcmask 1048416  }
 0x265   : > { %v1562_v28 = vpack.c.bf16 %v1560_v33, %v1480_v24 }
 0x266   : > { %1490 = vrot.lane.b32.xlu0 %v1482_v53, %s2735_s16 }
 0x268   : > { %1566 = vrot.lane.b32.xlu1 %v1395_v4, %s2729_s30 }
 0x26a   : > { %1512 = vrot.lane.b32.xlu0 %v3336_v0, %s2723_s24  ;;  %s1957_s24 = sshll.u32 %s3486_s17, 4  ;;  %s3503_s24 = int_to_ptr.vmem [resolvable:$true] %s1957_s24 }
 0x26b   : > { %s2638_s8 = scalar_lea.vmem %s3503_s24, 1024 }
 0x26c   : > { %1344 = vrot.lane.b32.xlu1 %v1336_v55, %s2734_s13  ;;  %p2639_p3 = scmp.ne.s32.totalorder %s3503_s24, %s2638_s8 }
 0x26e   : > { %1568 = vrot.lane.b32.xlu0 %v1396_v39, %s2729_s30  ;;  %p2640_p5 = pnand %p2639_p3, %p2929_p10 }
 0x270   : > { %1401 = vrot.lane.b32.xlu1 %v1393_v37, %s2724_s26  ;;  %p2641_p7 = pneg %p2640_p5 }
 0x274   : > { %1570 = vrot.lane.b32.xlu1 %v1562_v28, %s2729_s30  ;;  %s2642_s30 = sshll.u32 %s2737_s15, 4  ;;  %s2643_s30 = int_to_ptr.vmem [resolvable:$false] %s2642_s30 }
 0x275   : > { %s2644_s7 = scalar_lea.vmem %s2643_s30, 2048  ;;  %p2645_p12 = scmp.lt.s32.totalorder %s3503_s24, %s2643_s30 }
 0x276   : > { %p2646_p2 = scmp.lt.s32.totalorder %s2644_s7, %s2638_s8 }
 0x278   : > { %p2647_p1 = por %p2646_p2, %p2645_p12 }
 0x27a   : > { %p2648_p13 = pnand %p2647_p1, %p2641_p7 }
 0x2a0   : > { %v3432_v60 = vpop.permute.xlu0 %1426 }
 0x2a1   : > { %1440 = vst.msk [vmem:[#allocation2 + $0x8] sm:$0xff] %vm398_vm5, %v3432_v60 }
 0x2a8   : > { %v1429_v0 = vpop.permute.xlu0 %1428 }
 0x2a9   : > { %1442 = vst.msk [vmem:[#allocation2 + $0x38] sm:$0xff] %vm398_vm5, %v1429_v0 }
 0x2aa   : > { %v1347_v61 = vpop.permute.xlu1 %1346 }
 0x2ab   : > { %1358 = vst.msk [vmem:[#allocation2 + $0x30] sm:$0xff] %vm1356_vm0, %v1347_v61 }
 0x2ac   : > { %v1493_v62 = vpop.permute.xlu0 %1492 }
 0x2ae   : > { %v1404_v63 = vpop.permute.xlu1 %1403 }
 0x2af   : > { %1415 = vst.msk [vmem:[#allocation2 + $0x30] sm:$0xff] %vm1413_vm15, %v1404_v63 }
 0x2b0   : > { %1441 = vst.msk [vmem:[#allocation2 + $0x30] sm:$0xff] %vm1438_vm1, %v1429_v0  ;;  %v1515_v59 = vpop.permute.xlu0 %1514 }
 0x2b2   : > { %v3440_v49 = vpop.permute.xlu1 %1537 }
 0x2b3   : > { %1551 = vst.msk [vmem:[#allocation2 + $0x10] sm:$0xff] %vm486_vm3, %v3440_v49 }
 0x2b4   : > { %v1540_v36 = vpop.permute.xlu0 %1539 }
 0x2b5   : > { %1553 = vst.msk [vmem:[#allocation2 + $0x40] sm:$0xff] %vm486_vm3, %v1540_v36 }
 0x2b6   : > { %v1464_v42 = vpop.permute.xlu1 %1463 }
 0x2b7   : > { %1475 = vst.msk [vmem:[#allocation2 + $0x38] sm:$0xff] %vm1473_vm2, %v1464_v42  ;;  %v1584_v6 = vld [vmem:[#allocation2 + $0x30] sm:$0xff] }
 0x2b8   : > { %1504 = vst.msk [vmem:[#allocation2 + $0x38] sm:$0xff] %vm1502_vm6, %v1493_v62  ;;  %v1349_v2 = vpop.permute.xlu0 %1348  ;;  %v2128_v62 = vld [vmem:[#allocation12] ss:$0 sm:$0xff] }
 0x2b9   : > { %1359 = vst.msk [vmem:[#allocation2 + $0x60] sm:$0xff] %vm1356_vm0, %v1349_v2 }
 0x2ba   : > { %1526 = vst.msk [vmem:[#allocation2 + $0x38] sm:$0xff] %vm1524_vm7, %v1515_v59  ;;  %v1431_v4 = vpop.permute.xlu1 %1430 }
 0x2bb   : > { %1552 = vst.msk [vmem:[#allocation2 + $0x38] sm:$0xff] %vm1549_vm8, %v1540_v36 }
 0x2bc   : > { %1444 = vst.msk [vmem:[#allocation2 + $0x68] sm:$0xff] %vm398_vm5, %v1431_v4  ;;  %v1406_v5 = vpop.permute.xlu0 %1405 }
 0x2bd   : > { %1416 = vst.msk [vmem:[#allocation2 + $0x60] sm:$0xff] %vm1413_vm15, %v1406_v5 }
 0x2be   : > { %1443 = vst.msk [vmem:[#allocation2 + $0x60] sm:$0xff] %vm1438_vm1, %v1431_v4  ;;  %v1495_v8 = vpop.permute.xlu1 %1494 }
 0x2c0   : > { %v1466_v11 = vpop.permute.xlu0 %1465 }
 0x2c1   : > { %1476 = vst.msk [vmem:[#allocation2 + $0x68] sm:$0xff] %vm1473_vm2, %v1466_v11 }
 0x2c2   : > { %v1585_v14 = vld [vmem:[#allocation2 + $0x38] sm:$0xff]  ;;  %1505 = vst.msk [vmem:[#allocation2 + $0x68] sm:$0xff] %vm1502_vm6, %v1495_v8  ;;  %v1517_v3 = vpop.permute.xlu1 %1516 }
 0x2c3   : > { %1821 = vmatprep.mubr.bf16.mxu1 %v1585_v14  ;;  %1527 = vst.msk [vmem:[#allocation2 + $0x68] sm:$0xff] %vm1524_vm7, %v1517_v3 }
 0x2c4   : > { %1822 = vmatmul.mubr.bf16.vlgmr.msra.gmra.mrb[16].mxu1 %v1584_v6  ;;  %v1433_v15 = vpop.permute.xlu0 %1432 }
 0x2c5   : > { %2290 = vmatpush3.bf16.msra.mxu1 %v3395_v17  ;;  %1446 = vst.msk [vmem:[#allocation2 + $0x98] sm:$0xff] %vm398_vm5, %v1433_v15  ;;  %v1587_v12 = vld [vmem:[#allocation2 + $0x60] sm:$0xff]  ;;  %vm1777_vm5 = vcmask 1041408  }
 0x2c6   : > { %2291 = vmatprep.subr.bf16.mxu1 %v2492_v9  ;;  %v1542_v7 = vpop.permute.xlu1 %1541  ;;  %v1779_v24 = vsel %vm1777_vm5, %v2495_v1, 0 }
 0x2c7   : > { %1554 = vst.msk [vmem:[#allocation2 + $0x68] sm:$0xff] %vm1549_vm8, %v1542_v7 }
 0x2c8   : > { %1555 = vst.msk [vmem:[#allocation2 + $0x70] sm:$0xff] %vm486_vm3, %v1542_v7  ;;  %v1519_v10 = vpop.permute.xlu0 %1518 }
 0x2c9   : > { %2292 = vmatpush3.bf16.msra.mxu1 %v2492_v9 }
 0x2ca   : > { %2293 = vmatprep.subr.bf16.mxu1 %v2493_v16  ;;  %v1351_v19 = vpop.permute.xlu1 %1350 }
 0x2cb   : > { %1360 = vst.msk [vmem:[#allocation2 + $0x90] sm:$0xff] %vm1356_vm0, %v1351_v19 }
 0x2cc   : > { %v1497_v21 = vpop.permute.xlu0 %1496 }
 0x2cd   : > { %2294 = vmatpush3.bf16.msra.mxu1 %v2493_v16 }
 0x2ce   : > { %2295 = vmatprep.subr.bf16.mxu1 %v2494_v18  ;;  %v1408_v17 = vpop.permute.xlu1 %1407  ;;  %v1588_v22 = vld [vmem:[#allocation2 + $0x68] sm:$0xff] }
 0x2cf   : > { %1417 = vst.msk [vmem:[#allocation2 + $0x90] sm:$0xff] %vm1413_vm15, %v1408_v17  ;;  %1829 = vmatprep.mubr.bf16.mxu1 %v1588_v22 }
 0x2d0   : > { %1445 = vst.msk [vmem:[#allocation2 + $0x90] sm:$0xff] %vm1438_vm1, %v1433_v15  ;;  %1830 = vmatmul.mubr.bf16.gmra.mrb[20].mxu1 %v1587_v12  ;;  %v1544_v13 = vpop.permute.xlu0 %1543 }
 0x2d1   : > { %1557 = vst.msk [vmem:[#allocation2 + $0xa0] sm:$0xff] %vm486_vm3, %v1544_v13  ;;  %2296 = vmatpush3.bf16.msra.mxu1 %v2494_v18  ;;  %vm1764_vm3 = vcmask 556032  }
 0x2d2   : > { %v1468_v23 = vpop.permute.xlu1 %1467  ;;  %2323 = vmatprep.subr.msk.bf16.mxu1 %vm1777_vm5, %v2495_v1 }
 0x2d3   : > { %1477 = vst.msk [vmem:[#allocation2 + $0x98] sm:$0xff] %vm1473_vm2, %v1468_v23 }
 0x2d4   : > { %1506 = vst.msk [vmem:[#allocation2 + $0x98] sm:$0xff] %vm1502_vm6, %v1497_v21  ;;  %v1462_v25 = vpop.permute.xlu0 %1461 }
 0x2d5   : > { %1528 = vst.msk [vmem:[#allocation2 + $0x98] sm:$0xff] %vm1524_vm7, %v1519_v10  ;;  %2298 = vmatpush3.bf16.msra.mxu1 %v1779_v24 }
 0x2d6   : > { %1474 = vst.msk [vmem:[#allocation2 + $0x8] sm:$0xff] %vm1473_vm2, %v1462_v25  ;;  %v1565_v26 = vpop.permute.xlu1 %1564 }
 0x2d7   : > { %1556 = vst.msk [vmem:[#allocation2 + $0x98] sm:$0xff] %vm1549_vm8, %v1544_v13  ;;  %v1590_v38 = vld [vmem:[#allocation2 + $0x90] sm:$0xff] }
 0x2d8   : > { %1577 = vst.msk [vmem:[#allocation2 + $0x10] sm:$0xff] %vm1576_vm9, %v1565_v26  ;;  %v1491_v29 = vpop.permute.xlu0 %1490 }
 0x2d9   : > { %1503 = vst.msk [vmem:[#allocation2 + $0x8] sm:$0xff] %vm1502_vm6, %v1491_v29 }
 0x2da   : > { %v1567_v30 = vpop.permute.xlu1 %1566 }
 0x2db   : > { %1578 = vst.msk [vmem:[#allocation2 + $0x40] sm:$0xff] %vm1576_vm9, %v1567_v30 }
 0x2dc   : > { %v1513_v32 = vpop.permute.xlu0 %1512 }
 0x2dd   : > { %1525 = vst.msk [vmem:[#allocation2 + $0x8] sm:$0xff] %vm1524_vm7, %v1513_v32 }
 0x2de   : > { %v1591_v31 = vld [vmem:[#allocation2 + $0x98] sm:$0xff]  ;;  %1550 = vst.msk [vmem:[#allocation2 + $0x8] sm:$0xff] %vm1549_vm8, %v3440_v49  ;;  %v1345_v35 = vpop.permute.xlu1 %1344 }
 0x2df   : > { %1837 = vmatprep.mubr.bf16.mxu1 %v1591_v31  ;;  %v1583_v39 = vld [vmem:[#allocation2 + $0x10] sm:$0xff]  ;;  %1357 = vst.msk [vmem:[#allocation2] sm:$0xff] %vm1356_vm0, %v1345_v35 }
 0x2e0   : > { %1838 = vmatmul.mubr.bf16.gmra.mrb[24].mxu1 %v1590_v38  ;;  %v1569_v40 = vpop.permute.xlu0 %1568 }
 0x2e1   : > { %2299 = vmatprep.mubr.msk.bf16.mxu1 %vm1764_vm3, %v1583_v39  ;;  %1579 = vst.msk [vmem:[#allocation2 + $0x70] sm:$0xff] %vm1576_vm9, %v1569_v40 }
 0x2e2   : > { %v1402_v41 = vpop.permute.xlu1 %1401  ;;  %v1586_v27 = vld [vmem:[#allocation2 + $0x40] sm:$0xff] }
 0x2e3   : > { %1414 = vst.msk [vmem:[#allocation2] sm:$0xff] %vm1413_vm15, %v1402_v41 }
 0x2e4   : > { %1439 = vst.msk [vmem:[#allocation2] sm:$0xff] %vm1438_vm1, %v3432_v60 }
 0x2e5   : > { %v1582_v43 = vld [vmem:[#allocation2 + $0x8] sm:$0xff] }
 0x2e6   : > { %v1571_v20 = vpop.permute.xlu1 %1570  ;;  %1813 = vmatprep.mubr.bf16.mxu0 %v1582_v43 }
 0x2e7   : > { %1580 = vst.msk [vmem:[#allocation2 + $0xa0] sm:$0xff] %vm1576_vm9, %v1571_v20 }
 0x2e8   : > { %2300 = vmatmul.mubr.msk.bf16.vlgmr.msra.gmra.mrb[28].mxu1 %vm1764_vm3, %v1586_v27  ;;  %v1589_v45 = vld [vmem:[#allocation2 + $0x70] sm:$0xff] }
 0x2e9   : > { %2303 = vmatprep.mubr.msk.bf16.mxu1 %vm1764_vm3, %v1589_v45 }
 0x2eb   : > { %v1581_v46 = vld [vmem:[#allocation2] sm:$0xff] }
 0x2ec   : > { %1814 = vmatmul.mubr.bf16.vlgmr.msra.gmra.mrb[32].mxu0 %v1581_v46 }
 0x2ee   : > { %v1592_v47 = vld [vmem:[#allocation2 + $0xa0] sm:$0xff] }
 0x2f0   : > { %2304 = vmatmul.mubr.msk.bf16.gmra.mrb[32].mxu1 %vm1764_vm3, %v1592_v47 }
 0x397   : > { %v2262_v48 = vpop.f32.mrb[16].mxu1 }
 0x398   : > { %v2263_v50 = vpop.f32.mrb[17].mxu1 }
 0x399   : > { %v2264_v51 = vadd.f32 %v2263_v50, %v2262_v48  ;;  %v2265_v52 = vpop.f32.mrb[18].mxu1 }
 0x39a   : > { %v2266_v53 = vpop.f32.mrb[19].mxu1 }
 0x39b   : > { %v2267_v34 = vadd.f32 %v2266_v53, %v2265_v52  ;;  %v1824_v63 = vadd.f32 %v2264_v51, %v2128_v62 }
 0x39d   : > { %v1827_v42 = vadd.f32 %v2267_v34, %v2128_v62 }
 0x3a3   : > { %v2268_v54 = vpop.f32.mrb[20].mxu1 }
 0x3a4   : > { %v2269_v44 = vpop.f32.mrb[21].mxu1 }
 0x3a5   : > { %v2270_v55 = vadd.f32 %v2269_v44, %v2268_v54  ;;  %v2271_v56 = vpop.f32.mrb[22].mxu1 }
 0x3a6   : > { %v2272_v57 = vpop.f32.mrb[23].mxu1 }
 0x3a7   : > { %v2273_v58 = vadd.f32 %v2272_v57, %v2271_v56  ;;  %v1832_v19 = vadd.f32 %v2270_v55, %v2128_v62 }
 0x3a9   : > { %v1835_v24 = vadd.f32 %v2273_v58, %v2128_v62 }
 0x3b3   : > { %v2274_v37 = vpop.f32.mrb[24].mxu1 }
 0x3b4   : > { %v2275_v33 = vpop.f32.mrb[25].mxu1 }
 0x3b5   : > { %v2276_v28 = vadd.f32 %v2275_v33, %v2274_v37  ;;  %v2277_v60 = vpop.f32.mrb[26].mxu1 }
 0x3b6   : > { %v2278_v0 = vpop.f32.mrb[27].mxu1 }
 0x3b7   : > { %v2279_v61 = vadd.f32 %v2278_v0, %v2277_v60  ;;  %v1840_v7 = vadd.f32 %v2276_v28, %v2128_v62 }
 0x3b9   : > { %v1843_v13 = vadd.f32 %v2279_v61, %v2128_v62 }
 0x3bb   : > { %v2301_v59 = vpop.f32.mrb[28].mxu1 }
 0x3bc   : > { %v1889_v49 = vadd.f32 %v2301_v59, %v1824_v63  ;;  %v1880_v36 = vpop.f32.mrb[29].mxu1 }
 0x3bd   : > { %v2302_v2 = vpop.f32.mrb[30].mxu1 }
 0x3be   : > { %vm1913_vm10 = vcmp.gt.f32.partialorder %v1889_v49, 0.0  ;;  %v1921_v4 = vmul.f32 0.1, %v1889_v49  ;;  %v1892_v5 = vadd.f32 %v2302_v2, %v1827_v42  ;;  %v1883_v8 = vpop.f32.mrb[31].mxu1 }
 0x3bf   : > { %v2256_v9 = vpop.f32.mrb[32].mxu0 }
 0x3c0   : > { %v1929_v11 = vsel %vm1913_vm10, %v1889_v49, %v1921_v4  ;;  %vm1914_vm11 = vcmp.gt.f32.partialorder %v1892_v5, 0.0  ;;  %v1922_v14 = vmul.f32 0.1, %v1892_v5  ;;  %v2257_v3 = vpop.f32.mrb[33].mxu0 }
 0x3c1   : > { %1937 = vst.msk [vmem:[%s3486_s17 + $0x10] sm:$0xff] %vm1229_vm4, %v1929_v11  ;;  %v2258_v15 = vadd.f32 %v2257_v3, %v2256_v9  ;;  %v2259_v16 = vpop.f32.mrb[34].mxu0 }
 0x3c2   : > { %v1930_v6 = vsel %vm1914_vm11, %v1892_v5, %v1922_v14  ;;  %v2260_v10 = vpop.f32.mrb[35].mxu0 }
 0x3c3   : > { %1938 = vst.msk [vmem:[%s3486_s17 + $0x18] sm:$0xff] %vm1229_vm4, %v1930_v6  ;;  %v2305_v18 = vpop.f32.mrb[32].mxu1  ;;  %v1816_v21 = vadd.f32 %v2258_v15, %v2128_v62  ;;  %v2261_v17 = vadd.f32 %v2260_v10, %v2259_v16 }
 0x3c4   : > { %v1905_v22 = vadd.f32 %v2305_v18, %v1840_v7  ;;  %v1896_v1 = vpop.f32.mrb[33].mxu1 }
 0x3c5   : > { %v1897_v12 = vadd.f32 %v1896_v1, %v1832_v19  ;;  %v2306_v23 = vpop.f32.mrb[34].mxu1  ;;  %v1881_v25 = vadd.f32 %v1880_v36, %v1816_v21  ;;  %v1819_v26 = vadd.f32 %v2261_v17, %v2128_v62 }
 0x3c6   : > { %vm1917_vm12 = vcmp.gt.f32.partialorder %v1905_v22, 0.0  ;;  %v1925_v29 = vmul.f32 0.1, %v1905_v22  ;;  %v1899_v30 = vpop.f32.mrb[35].mxu1  ;;  %v1908_v31 = vadd.f32 %v2306_v23, %v1843_v13 }
 0x3c7   : > { %vm1915_vm13 = vcmp.gt.f32.partialorder %v1897_v12, 0.0  ;;  %v1923_v32 = vmul.f32 0.1, %v1897_v12  ;;  %v1900_v35 = vadd.f32 %v1899_v30, %v1835_v24  ;;  %vm1911_vm14 = vcmp.gt.f32.partialorder %v1881_v25, 0.0 }
 0x3c8   : > { %v1919_v38 = vmul.f32 0.1, %v1881_v25  ;;  %v1884_v39 = vadd.f32 %v1883_v8, %v1819_v26  ;;  %v1933_v40 = vsel %vm1917_vm12, %v1905_v22, %v1925_v29  ;;  %vm1918_vm0 = vcmp.gt.f32.partialorder %v1908_v31, 0.0 }
 0x3c9   : > { %1941 = vst.msk [vmem:[%s3486_s17 + $0x30] sm:$0xff] %vm1229_vm4, %v1933_v40  ;;  %v1931_v41 = vsel %vm1915_vm13, %v1897_v12, %v1923_v32  ;;  %v1926_v43 = vmul.f32 0.1, %v1908_v31  ;;  %vm1916_vm15 = vcmp.gt.f32.partialorder %v1900_v35, 0.0  ;;  %v1924_v45 = vmul.f32 0.1, %v1900_v35 }
 0x3ca   : > { %v1927_v20 = vsel %vm1911_vm14, %v1881_v25, %v1919_v38  ;;  %vm1912_vm1 = vcmp.gt.f32.partialorder %v1884_v39, 0.0  ;;  %v1920_v27 = vmul.f32 0.1, %v1884_v39  ;;  %1939 = vst.msk [vmem:[%s3486_s17 + $0x20] sm:$0xff] %vm1229_vm4, %v1931_v41 }
 0x3cb   : > { %1935 = vst.msk [vmem:[%s3486_s17] sm:$0xff] %vm1229_vm4, %v1927_v20  ;;  %v1934_v46 = vsel %vm1918_vm0, %v1908_v31, %v1926_v43  ;;  %v1932_v48 = vsel %vm1916_vm15, %v1900_v35, %v1924_v45 }
 0x3cc   : > { %v1928_v47 = vsel %vm1912_vm1, %v1884_v39, %v1920_v27  ;;  %1942 = vst.msk [vmem:[%s3486_s17 + $0x38] sm:$0xff] %vm1229_vm4, %v1934_v46  ;;  %1940 = vst.msk [vmem:[%s3486_s17 + $0x28] sm:$0xff] %vm1229_vm4, %v1932_v48 }
 0x3cd   : > { %1936 = vst.msk [vmem:[%s3486_s17 + $0x8] sm:$0xff] %vm1229_vm4, %v1928_v47 }
 0x3ce   : > { %2651 = shalt.err (!%p2648_p13)
}
 0x3cf   : > { %s2652_s11 = scalar_lea.hbm %s3501_s9, 1024  ;;  %s2656_s6 = scalar_lea.hbm %s3560_s5, 2048 }
 0x3d0   : > { %p2653_p9 = scmp.ne.s32.totalorder %s3501_s9, %s2652_s11  ;;  %p2657_p6 = scmp.lt.u32.totalorder %s3501_s9, %s3560_s5 }
 0x3d1   : > { %p2658_p4 = scmp.lt.u32.totalorder %s2656_s6, %s2652_s11  ;;  %p2660_p3 = scmp.lt.u32.totalorder %s2652_s11, %s3501_s9 }
 0x3d2   : > { %p2654_p0 = pnand %p2653_p9, %p2929_p10 }
 0x3d3   : > { %p2659_p8 = por %p2658_p4, %p2657_p6 }
 0x3d4   : > { %p2655_p11 = pneg %p2654_p0 }
 0x3d5   : > { %p2661_p5 = por %p2660_p3, %p2659_p8 }
 0x3d7   : > { %p2662_p7 = pnand %p2661_p5, %p2655_p11 }
 0x3d9   : > { %2665 = shalt.err (!%p2662_p7)
}
 0x3da   : > { %s2738_s10 = smov 128   ;;  %s2739_s22 = smov 8  }
 0x3db   : > { %2345 = dma.vmem_to_hbm [thread:$0]  (%p2929_p10), %s3503_s24, 1024, %s3501_s9, %s1944_s12, %s2738_s10, %s2738_s10, %s2739_s22  }
 0x3dc PF: > { %s1972_s26 = sand.u32 1, %s2700_s18   ;;  %p3578_p12 = scmp.ne.s32.totalorder %s3565_s25, 0 }
 0x3dd   : > { %p3579_p2 = scmp.ge.s32.totalorder %s2712_s21, 2  ;;  %s1973_s8 = scalar_lea.sflag [#allocation6], %s1972_s26 }
 0x3df   : > { %p2365_p1 = pnand %p3579_p2, %p3578_p12 }
 0x3e1   : > { %2695 = dma.done.wait (!%p2365_p1), %s1973_s8, 1024  }
 0x3e2   : > { %2697 = vsyncadd (!%p2365_p1), %s1973_s8, 4294966272  ;;  %p20_p13 = scmp.ge.s32.totalorder %s2919_s14, 4   ;;  %s3580_s18 = smov %s2704_s19 }
 0x3e3   : > { %s3581_s19 = smov %s2708_s20  ;;  %s3582_s20 = smov %s2935_s28 }
 0x3e4   : > { %s3583_s21 = smov %s2919_s14  ;;  %22 = sbr.rel (!%p20_p13) target bundleno = 7 (0x7), region = 102 }
 0x3eb   :  { %1978 = vsyncpa [#allocation5], 1 }
 0x3ec   :  { %1980 = vsyncpa [#allocation5 + $0x1], 1 }
 0x3ed   :  { %1981 = vsyncpa [#allocation8], 1 }
 0x3ee   :  { %1982 = vsyncpa [#allocation11], 1 }
 0x3ef   :  { %1983 = vsyncpa [#allocation6], 1 }
 0x3f0   :  { %1985 = vsyncpa [#allocation6 + $0x1], 1 }

</bundles_post_ra>
